<compile_context>
chip_gen: v7x
topology: tpu7x:2x2x1
jax: 0.10.0
libtpu: 0.0.40
codegen_flags: <defaults>
</compile_context>

<pallas_src>
import functools

import jax
import jax.numpy as jnp
import numpy as np
from jax import lax
from jax.experimental import pallas as pl
from jax.experimental.pallas import tpu as pltpu

LP_OCC_FEATURE_ID = 8
N_ATOM_TARGETS = 4
N_BOND_TARGETS = 7
N_LP_TARGETS = 5
N_LP_TARGETS_CE = 4
N_NODE_FEATS = N_ATOM_TARGETS + N_LP_TARGETS + N_BOND_TARGETS  # 16

_NODES_PER_ROW = 128 // N_NODE_FEATS      # 8 packed nodes per 128-lane row
assert _NODES_PER_ROW * N_NODE_FEATS == 128
_ROW_ALIGN = 32                           # int8 native sublane tile
_DEFAULT_BLOCK_ROWS = 2048                # 16384 nodes per grid step
_NUM_CORES = 2                            # leading "parallel" axis (v7x 2 TCs)
_OUT_ROWS = 48                            # 6 x (8,128) partial-sum slabs


def _ce_group_allreduce(x, op):
    """All-reduce over each node's 4 CE lanes.

    CE lanes form 4-wide groups at lane offsets 4..7 of every 16-lane node
    slot.  Non-CE lanes must hold `op`'s neutral element; results are only
    meaningful on CE lanes.  Implemented as symmetric +/-1 then +/-3 lane
    rotations (a contiguous +/-4 window), which never reaches a neighbouring
    node's CE lanes and is independent of the rotation sign convention.
    """
    n = x.shape[-1]
    y = op(op(x, pltpu.roll(x, shift=1, axis=1)), pltpu.roll(x, shift=n - 1, axis=1))
    return op(op(y, pltpu.roll(y, shift=3, axis=1)), pltpu.roll(y, shift=n - 3, axis=1))


def _vreg_partials(x):
    """(B, 128) -> (8, 128) partial sums via pure cross-vreg VPU adds."""
    b = x.shape[0]
    return x.reshape(b // 8, 8, 128).sum(axis=0)


def _total_loss_kernel(node_pred_ref, node_tgt_ref, node_type_ref,
                       link_pred_ref, link_tgt_ref,
                       a2b_pred_ref, a2b_tgt_ref,
                       int_pred_ref, int_tgt_ref,
                       out_ref,
                       acc_sq, acc_mask, acc_ce, acc_link, acc_a2b, acc_int,
                       *, inner_steps, n_link, ce_softmax_metrics):
    f32 = jnp.float32
    step = pl.program_id(1)

    @pl.when(step == 0)
    def _init():
        for acc in (acc_sq, acc_mask, acc_ce, acc_link, acc_a2b, acc_int):
            acc[...] = jnp.zeros_like(acc)

    # ---------------- node stream -----------------------------------------
    yp = node_pred_ref[...].astype(f32)            # (B, 128)
    yt = node_tgt_ref[...].astype(f32)             # (B, 128)
    # int8 class ids widened directly to f32 (single dequant-style convert,
    # no i8->i32 intermediate); the class compare then runs on f32 VALU.
    ntype = node_type_ref[...].astype(f32)         # (B, 128)

    lane = lax.broadcasted_iota(jnp.int32, (1, 128), 1)
    feat = lane % N_NODE_FEATS
    ce_mask = (feat >= N_ATOM_TARGETS) & (feat < N_ATOM_TARGETS + N_LP_TARGETS_CE)
    # class owning each feature column: 0=atom (0:4), 1=lp (4:9), 2=bond (9:16)
    col_class = jnp.where(feat < N_ATOM_TARGETS, 0,
                          jnp.where(feat < N_ATOM_TARGETS + N_LP_TARGETS, 1, 2)
                          ).astype(f32)
    row_mask = (ntype == col_class).astype(f32)    # (B, 128)

    # Per-node softmax over the 4 CE lanes (segmented along the lane axis).
    neg = f32(-1e30)
    mx = _ce_group_allreduce(jnp.where(ce_mask, yp, neg), jnp.maximum)
    e = jnp.exp(jnp.where(ce_mask, yp - mx, neg))               # exp(-1e30) == 0
    denom = jnp.where(ce_mask, _ce_group_allreduce(e, jnp.add), 1.0)
    log_probs = jnp.where(ce_mask, (yp - mx) - jnp.log(denom), 0.0)

    if ce_softmax_metrics:
        # Exact softmax probabilities; these only feed the loss_node_4..7
        # metrics (NodeLoss.log_mse_metric), not the loss terms.
        pred_eff = jnp.where(ce_mask, e / denom, yp)
    else:
        pred_eff = yp        # CE-column metrics fall back to raw-logit MSE
    sq_eff = (yt - pred_eff) ** 2

    acc_sq[...] += _vreg_partials(sq_eff * row_mask)
    acc_mask[...] += _vreg_partials(row_mask)
    acc_ce[...] += _vreg_partials(-(yt * log_probs) * row_mask)

    # ---------------- edge / interaction streams --------------------------
    blk = pl.program_id(0) * inner_steps + step      # global stream block index

    x = link_pred_ref[...].astype(f32)               # (LB, 128)
    z = link_tgt_ref[...].astype(f32)
    r = lax.broadcasted_iota(jnp.int32, x.shape, 0)
    c = lax.broadcasted_iota(jnp.int32, x.shape, 1)
    valid = (blk * (x.shape[0] * 128) + r * 128 + c) < n_link
    bce = jnp.maximum(x, 0.0) - x * z + jnp.log(1.0 + jnp.exp(-jnp.abs(x)))
    acc_link[...] += _vreg_partials(jnp.where(valid, bce, 0.0))

    da = a2b_pred_ref[...].astype(f32) - a2b_tgt_ref[...].astype(f32)
    acc_a2b[...] += _vreg_partials(da * da)          # zero-padded -> self-masking

    di = int_pred_ref[...].astype(f32) - int_tgt_ref[...].astype(f32)
    acc_int[...] += _vreg_partials(di * di)          # zero-padded -> self-masking

    @pl.when(step == pl.num_programs(1) - 1)
    def _finalize():
        out_ref[0:8, :] = acc_sq[...]
        out_ref[8:16, :] = acc_mask[...]
        out_ref[16:24, :] = acc_ce[...]
        out_ref[24:32, :] = acc_link[...]
        out_ref[32:40, :] = acc_a2b[...]
        out_ref[40:48, :] = acc_int[...]


def _round_up(x, m):
    return ((x + m - 1) // m) * m


def _pack_slab(a, total_steps):
    """Flatten to a zero-padded (total_steps*block, 128) lane-dense slab."""
    flat = jnp.asarray(a).reshape(-1)
    n = int(flat.shape[0])
    rows = max(1, -(-n // 128))
    block = _round_up(-(-rows // total_steps), 8)
    pad = block * total_steps * 128 - n
    if pad:
        flat = jnp.pad(flat, (0, pad))
    return flat.reshape(block * total_steps, 128), block, n


def total_loss(y_hat, y, is_atom, is_lp, is_bond, *,
               block_rows=_DEFAULT_BLOCK_ROWS, ce_softmax_metrics=True):
    """Pallas TotalLoss forward. Returns (loss, metrics) like the nn.Module."""
    link_preds, a2b_preds, node_preds, int_preds = y_hat
    link_targets, a2b_targets, node_targets, int_targets = y
    # TODO(synk): perform_matching branch (get_matching + data-dependent edge
    # filtering) is host-side Python with no clean Pallas equivalent; this
    # implements the identity-matching path (perform_matching=False behavior).
    assert block_rows % _ROW_ALIGN == 0 and block_rows > 0

    n_nodes = int(node_preds.shape[0])
    n_rows = -(-n_nodes // _NODES_PER_ROW)
    per_core_rows = _round_up(max(-(-n_rows // _NUM_CORES), 1), _ROW_ALIGN)
    block_rows = min(block_rows, per_core_rows)
    inner_steps = max(1, -(-n_rows // (_NUM_CORES * block_rows)))
    total_steps = _NUM_CORES * inner_steps
    rows = total_steps * block_rows
    n_pad_nodes = rows * _NODES_PER_ROW

    def pack_nodes(a):
        a = jnp.asarray(a)
        if n_pad_nodes > n_nodes:
            a = jnp.pad(a, ((0, n_pad_nodes - n_nodes), (0, 0)))
        return a.reshape(rows, 128)

    node_pred_p = pack_nodes(node_preds)
    node_tgt_p = pack_nodes(node_targets)

    ia = jnp.asarray(is_atom).astype(jnp.bool_).reshape(-1)
    il = jnp.asarray(is_lp).astype(jnp.bool_).reshape(-1)
    ib = jnp.asarray(is_bond).astype(jnp.bool_).reshape(-1)
    node_type = jnp.where(ia, 0, jnp.where(il, 1, jnp.where(ib, 2, 3))).astype(jnp.int8)
    if n_pad_nodes > n_nodes:
        node_type = jnp.pad(node_type, (0, n_pad_nodes - n_nodes), constant_values=3)
    node_type_p = jnp.repeat(node_type, N_NODE_FEATS).reshape(rows, 128)

    link_p, link_block, n_link = _pack_slab(link_preds, total_steps)
    link_t, _, _ = _pack_slab(link_targets, total_steps)
    a2b_p, a2b_block, n_a2b = _pack_slab(a2b_preds, total_steps)
    a2b_t, _, _ = _pack_slab(a2b_targets, total_steps)
    int_p, int_block, n_int = _pack_slab(int_preds, total_steps)
    int_t, _, _ = _pack_slab(int_targets, total_steps)

    def stream_map(c, i):
        return (c * inner_steps + i, 0)

    node_spec = pl.BlockSpec((block_rows, 128), stream_map)
    link_spec = pl.BlockSpec((link_block, 128), stream_map)
    a2b_spec = pl.BlockSpec((a2b_block, 128), stream_map)
    int_spec = pl.BlockSpec((int_block, 128), stream_map)

    kernel = functools.partial(_total_loss_kernel, inner_steps=inner_steps,
                               n_link=n_link,
                               ce_softmax_metrics=ce_softmax_metrics)

    # Explicit VMEM budget: double-buffered node + slab blocks, accumulators,
    # output partials (+2x headroom), clamped to stay inside v7x's 64 MiB.
    need = 2 * (block_rows * 128 * (4 + 4 + 1)
                + (link_block + a2b_block + int_block) * 128 * 4 * 2)
    need += 6 * 8 * 128 * 4 + _NUM_CORES * _OUT_ROWS * 128 * 4
    vmem_limit = int(min(max(2 * need, 24 << 20), 48 << 20))

    out = pl.pallas_call(
        kernel,
        grid=(_NUM_CORES, inner_steps),
        in_specs=[node_spec, node_spec, node_spec,
                  link_spec, link_spec, a2b_spec, a2b_spec, int_spec, int_spec],
        out_specs=pl.BlockSpec((None, _OUT_ROWS, 128), lambda c, i: (c, 0, 0)),
        out_shape=jax.ShapeDtypeStruct((_NUM_CORES, _OUT_ROWS, 128), jnp.float32),
        scratch_shapes=[pltpu.VMEM((8, 128), jnp.float32)] * 6,
        compiler_params=pltpu.CompilerParams(
            dimension_semantics=("parallel", "arbitrary"),
            vmem_limit_bytes=vmem_limit),
    )(node_pred_p, node_tgt_p, node_type_p,
      link_p, link_t, a2b_p, a2b_t, int_p, int_t)

    # -------- tiny finalize in plain JAX (combine cores + divides) ----------
    parts = jnp.sum(out, axis=0)                      # (48, 128)
    sq = parts[0:8].sum(axis=0)                       # (128,) masked sq-err sums
    mk = parts[8:16].sum(axis=0)                      # (128,) mask counts
    ce = parts[16:24].sum(axis=0)                     # (128,) CE sums (CE lanes)
    link_sum = parts[24:32].sum()
    a2b_sum = parts[32:40].sum()
    int_sum = parts[40:48].sum()

    feat = jnp.arange(128) % N_NODE_FEATS
    n_atom = jnp.sum(jnp.where(feat == 0, mk, 0.0))
    n_lp = jnp.sum(jnp.where(feat == LP_OCC_FEATURE_ID, mk, 0.0))
    n_bond = jnp.sum(jnp.where(feat == N_ATOM_TARGETS + N_LP_TARGETS, mk, 0.0))

    # NOTE: an empty class gives 0/0 = NaN, matching PyTorch mean-over-empty.
    loss_atom = (jnp.sum(jnp.where(feat < N_ATOM_TARGETS, sq, 0.0))
                 / (n_atom * N_ATOM_TARGETS))
    loss_lp_clf = jnp.sum(ce) / n_lp
    loss_lp_mse = jnp.sum(jnp.where(feat == LP_OCC_FEATURE_ID, sq, 0.0)) / n_lp
    loss_orbital = (jnp.sum(jnp.where(feat >= N_ATOM_TARGETS + N_LP_TARGETS, sq, 0.0))
                    / (n_bond * N_BOND_TARGETS))
    a2b_loss = a2b_sum / n_a2b
    link_loss = link_sum / n_link
    int_loss = int_sum / n_int

    node_loss = loss_atom + loss_lp_clf + loss_lp_mse + loss_orbital
    loss = node_loss + a2b_loss + link_loss + int_loss

    col_sums = sq.reshape(_NODES_PER_ROW, N_NODE_FEATS).sum(axis=0)
    fidx = jnp.arange(N_NODE_FEATS)
    col_counts = jnp.where(fidx < N_ATOM_TARGETS, n_atom,
                           jnp.where(fidx < N_ATOM_TARGETS + N_LP_TARGETS, n_lp, n_bond))
    node_metrics = col_sums / col_counts

    metrics = {
        'loss_atom': loss_atom,
        'loss_lp_clf': loss_lp_clf,
        'loss_lp_mse': loss_lp_mse,
        'loss_orbital_mse': loss_orbital,
        'loss_node': node_loss,
        'loss_a2b': a2b_loss,
        'loss_link': link_loss,
        'loss_int': int_loss,
        'loss': loss,
    }
    for i in range(N_NODE_FEATS):
        metrics[f'loss_node_{i}'] = node_metrics[i]
    return loss, metrics


def _reference_total_loss(y_hat, y, is_atom, is_lp, is_bond):
    """Plain NumPy reference matching the PyTorch semantics."""
    link_p, a2b_p, node_p, int_p = [np.asarray(a, np.float64) for a in y_hat]
    link_t, a2b_t, node_t, int_t = [np.asarray(a, np.float64) for a in y]
    ia, il, ib = (np.asarray(m).astype(bool) for m in (is_atom, is_lp, is_bond))

    out = {}
    out['loss_atom'] = np.mean((node_t[ia, :N_ATOM_TARGETS]
                                - node_p[ia, :N_ATOM_TARGETS]) ** 2)
    logits = node_p[il, N_ATOM_TARGETS:N_ATOM_TARGETS + N_LP_TARGETS_CE]
    tgt = node_t[il, N_ATOM_TARGETS:N_ATOM_TARGETS + N_LP_TARGETS_CE]
    shifted = logits - logits.max(axis=-1, keepdims=True)
    log_sm = shifted - np.log(np.exp(shifted).sum(axis=-1, keepdims=True))
    out['loss_lp_clf'] = np.mean(-(tgt * log_sm).sum(axis=-1))
    out['loss_lp_mse'] = np.mean((node_t[il, LP_OCC_FEATURE_ID]
                                  - node_p[il, LP_OCC_FEATURE_ID]) ** 2)
    out['loss_orbital_mse'] = np.mean((node_t[ib, N_ATOM_TARGETS + N_LP_TARGETS:]
                                       - node_p[ib, N_ATOM_TARGETS + N_LP_TARGETS:]) ** 2)
    node_loss = (out['loss_atom'] + out['loss_lp_clf']
                 + out['loss_lp_mse'] + out['loss_orbital_mse'])
    a2b_loss = np.mean((a2b_p - a2b_t) ** 2)
    x, z = link_p, link_t
    link_loss = np.mean(np.maximum(x, 0.0) - x * z + np.log1p(np.exp(-np.abs(x))))
    int_loss = np.mean((int_p - int_t) ** 2)
    out['loss_a2b'] = a2b_loss
    out['loss_link'] = link_loss
    out['loss_int'] = int_loss
    out['loss'] = node_loss + a2b_loss + link_loss + int_loss

    node_p_eff = node_p.copy()
    node_p_eff[np.ix_(il, np.arange(N_ATOM_TARGETS, N_ATOM_TARGETS + N_LP_TARGETS_CE))] = \
        np.exp(log_sm)
    for i in range(N_NODE_FEATS):
        sl = ia if i < N_ATOM_TARGETS else (il if i < N_ATOM_TARGETS + N_LP_TARGETS else ib)
        out[f'loss_node_{i}'] = np.mean((node_t[sl, i] - node_p_eff[sl, i]) ** 2)
    return out


def _make_case(key, n_nodes, n_edges, n_a2b_rows, n_int_rows):
    ks = jax.random.split(key, 8)
    node_preds = jax.random.normal(ks[0], (n_nodes, N_NODE_FEATS), jnp.float32)
    node_targets = jax.random.normal(ks[1], (n_nodes, N_NODE_FEATS), jnp.float32)
    link_preds = jax.random.normal(ks[2], (n_edges, 1), jnp.float32)
    link_targets = (jax.random.uniform(ks[3], (n_edges, 1)) > 0.5).astype(jnp.float32)
    a2b_preds = jax.random.normal(ks[4], (n_a2b_rows, 3), jnp.float32)
    a2b_targets = jax.random.normal(ks[5], (n_a2b_rows, 3), jnp.float32)
    int_preds = jax.random.normal(ks[6], (n_int_rows, 2), jnp.float32)
    int_targets = jax.random.normal(ks[7], (n_int_rows, 2), jnp.float32)
    node_type = jnp.arange(n_nodes) % 3
    is_atom, is_lp, is_bond = (node_type == 0), (node_type == 1), (node_type == 2)
    return ((link_preds, a2b_preds, node_preds, int_preds),
            (link_targets, a2b_targets, node_targets, int_targets),
            is_atom, is_lp, is_bond)


if __name__ == "__main__":
    key = jax.random.PRNGKey(0)
    k1, k2 = jax.random.split(key)

    # Case 1: small problem, one block per core.
    y_hat, y, ia, il, ib = _make_case(k1, 24, 10, 6, 5)
    loss, metrics = total_loss(y_hat, y, ia, il, ib)
    jax.block_until_ready(loss)
    ref = _reference_total_loss(y_hat, y, ia, il, ib)
    np.testing.assert_allclose(np.asarray(loss), ref['loss'], rtol=1e-4, atol=1e-4)
    for k in ('loss_atom', 'loss_lp_clf', 'loss_lp_mse', 'loss_orbital_mse',
              'loss_a2b', 'loss_link', 'loss_int'):
        np.testing.assert_allclose(np.asarray(metrics[k]), ref[k], rtol=1e-4, atol=1e-4)
    np.testing.assert_allclose(np.asarray(metrics['loss_node_0']), ref['loss_node_0'],
                               rtol=1e-4, atol=1e-4)
    np.testing.assert_allclose(np.asarray(metrics['loss_node_4']), ref['loss_node_4'],
                               rtol=2e-3, atol=2e-3)
    for i in range(N_NODE_FEATS):
        assert np.isfinite(np.asarray(metrics[f'loss_node_{i}']))

    # Case 2: forced through the multi-step accumulator path (inner grid > 1).
    y_hat2, y2, ia2, il2, ib2 = _make_case(k2, 600, 300, 40, 30)
    loss2, metrics2 = total_loss(y_hat2, y2, ia2, il2, ib2, block_rows=32)
    jax.block_until_ready(loss2)
    ref2 = _reference_total_loss(y_hat2, y2, ia2, il2, ib2)
    np.testing.assert_allclose(np.asarray(loss2), ref2['loss'], rtol=1e-4, atol=1e-4)
    np.testing.assert_allclose(np.asarray(metrics2['loss_link']), ref2['loss_link'],
                               rtol=1e-4, atol=1e-4)
    np.testing.assert_allclose(np.asarray(metrics2['loss_lp_clf']), ref2['loss_lp_clf'],
                               rtol=1e-4, atol=1e-4)

    print("KERNEL_OK")
</pallas_src>

<mosaic_0001>
module attributes {stable_mosaic.version = 11 : i64} {
  func.func @_total_loss_kernel(%arg0: i32, %arg1: i32, %arg2: memref<32x128xf32, #tpu.memory_space<vmem>>, %arg3: memref<32x128xf32, #tpu.memory_space<vmem>>, %arg4: memref<32x128xi8, #tpu.memory_space<vmem>>, %arg5: memref<8x128xf32, #tpu.memory_space<vmem>>, %arg6: memref<8x128xf32, #tpu.memory_space<vmem>>, %arg7: memref<8x128xf32, #tpu.memory_space<vmem>>, %arg8: memref<8x128xf32, #tpu.memory_space<vmem>>, %arg9: memref<8x128xf32, #tpu.memory_space<vmem>>, %arg10: memref<8x128xf32, #tpu.memory_space<vmem>>, %arg11: memref<1x48x128xf32, #tpu.memory_space<vmem>>, %arg12: memref<8x128xf32, #tpu.memory_space<vmem>>, %arg13: memref<8x128xf32, #tpu.memory_space<vmem>>, %arg14: memref<8x128xf32, #tpu.memory_space<vmem>>, %arg15: memref<8x128xf32, #tpu.memory_space<vmem>>, %arg16: memref<8x128xf32, #tpu.memory_space<vmem>>, %arg17: memref<8x128xf32, #tpu.memory_space<vmem>>) attributes {dimension_semantics = [#tpu.dimension_semantics<parallel>, #tpu.dimension_semantics<arbitrary>], iteration_bounds = array<i64: 2, 1>, scalar_prefetch = 0 : i64, scratch_operands = 6 : i64, tpu.core_type = #tpu.core_type<tc>, window_params = [{transform_indices = @transform_0, window_bounds = array<i64: 32, 128>}, {transform_indices = @transform_1, window_bounds = array<i64: 32, 128>}, {transform_indices = @transform_2, window_bounds = array<i64: 32, 128>}, {transform_indices = @transform_3, window_bounds = array<i64: 8, 128>}, {transform_indices = @transform_4, window_bounds = array<i64: 8, 128>}, {transform_indices = @transform_5, window_bounds = array<i64: 8, 128>}, {transform_indices = @transform_6, window_bounds = array<i64: 8, 128>}, {transform_indices = @transform_7, window_bounds = array<i64: 8, 128>}, {transform_indices = @transform_8, window_bounds = array<i64: 8, 128>}, {transform_indices = @transform_9, window_bounds = array<i64: 1, 48, 128>}]} {
    %c0_i32 = arith.constant 0 : i32
    %0 = arith.cmpi eq, %arg1, %c0_i32 : i32
    %1 = arith.extui %0 : i1 to i32
    %c0_i32_0 = arith.constant 0 : i32
    %2 = arith.cmpi ne, %1, %c0_i32_0 : i32
    scf.if %2 {
      %cst_71 = arith.constant 0.000000e+00 : f32
      %160 = vector.broadcast %cst_71 : f32 to vector<8x128xf32>
      %c0_72 = arith.constant 0 : index
      %c0_73 = arith.constant 0 : index
      %161 = vector.load %arg12[%c0_72, %c0_73] : memref<8x128xf32, #tpu.memory_space<vmem>>, vector<8x128xf32>
      tpu.vector_store %arg12[%c0_72, %c0_73], %160 {strides = array<i32>} : memref<8x128xf32, #tpu.memory_space<vmem>>, vector<8x128xf32>,
      %cst_74 = arith.constant 0.000000e+00 : f32
      %162 = vector.broadcast %cst_74 : f32 to vector<8x128xf32>
      %c0_75 = arith.constant 0 : index
      %c0_76 = arith.constant 0 : index
      %163 = vector.load %arg13[%c0_75, %c0_76] : memref<8x128xf32, #tpu.memory_space<vmem>>, vector<8x128xf32>
      tpu.vector_store %arg13[%c0_75, %c0_76], %162 {strides = array<i32>} : memref<8x128xf32, #tpu.memory_space<vmem>>, vector<8x128xf32>,
      %cst_77 = arith.constant 0.000000e+00 : f32
      %164 = vector.broadcast %cst_77 : f32 to vector<8x128xf32>
      %c0_78 = arith.constant 0 : index
      %c0_79 = arith.constant 0 : index
      %165 = vector.load %arg14[%c0_78, %c0_79] : memref<8x128xf32, #tpu.memory_space<vmem>>, vector<8x128xf32>
      tpu.vector_store %arg14[%c0_78, %c0_79], %164 {strides = array<i32>} : memref<8x128xf32, #tpu.memory_space<vmem>>, vector<8x128xf32>,
      %cst_80 = arith.constant 0.000000e+00 : f32
      %166 = vector.broadcast %cst_80 : f32 to vector<8x128xf32>
      %c0_81 = arith.constant 0 : index
      %c0_82 = arith.constant 0 : index
      %167 = vector.load %arg15[%c0_81, %c0_82] : memref<8x128xf32, #tpu.memory_space<vmem>>, vector<8x128xf32>
      tpu.vector_store %arg15[%c0_81, %c0_82], %166 {strides = array<i32>} : memref<8x128xf32, #tpu.memory_space<vmem>>, vector<8x128xf32>,
      %cst_83 = arith.constant 0.000000e+00 : f32
      %168 = vector.broadcast %cst_83 : f32 to vector<8x128xf32>
      %c0_84 = arith.constant 0 : index
      %c0_85 = arith.constant 0 : index
      %169 = vector.load %arg16[%c0_84, %c0_85] : memref<8x128xf32, #tpu.memory_space<vmem>>, vector<8x128xf32>
      tpu.vector_store %arg16[%c0_84, %c0_85], %168 {strides = array<i32>} : memref<8x128xf32, #tpu.memory_space<vmem>>, vector<8x128xf32>,
      %cst_86 = arith.constant 0.000000e+00 : f32
      %170 = vector.broadcast %cst_86 : f32 to vector<8x128xf32>
      %c0_87 = arith.constant 0 : index
      %c0_88 = arith.constant 0 : index
      %171 = vector.load %arg17[%c0_87, %c0_88] : memref<8x128xf32, #tpu.memory_space<vmem>>, vector<8x128xf32>
      tpu.vector_store %arg17[%c0_87, %c0_88], %170 {strides = array<i32>} : memref<8x128xf32, #tpu.memory_space<vmem>>, vector<8x128xf32>,
    } else {
    }
    %c0 = arith.constant 0 : index
    %c0_1 = arith.constant 0 : index
    %3 = vector.load %arg2[%c0, %c0_1] : memref<32x128xf32, #tpu.memory_space<vmem>>, vector<32x128xf32>
    %c0_2 = arith.constant 0 : index
    %c0_3 = arith.constant 0 : index
    %4 = vector.load %arg3[%c0_2, %c0_3] : memref<32x128xf32, #tpu.memory_space<vmem>>, vector<32x128xf32>
    %c0_4 = arith.constant 0 : index
    %c0_5 = arith.constant 0 : index
    %5 = vector.load %arg4[%c0_4, %c0_5] : memref<32x128xi8, #tpu.memory_space<vmem>>, vector<32x128xi8>
    %6 = arith.sitofp %5 : vector<32x128xi8> to vector<32x128xf32>
    %7 = tpu.iota {dimensions = array<i32: 1>} : vector<1x128xi32>
    %c16_i32 = arith.constant 16 : i32
    %c0_i32_6 = arith.constant 0 : i32
    %8 = arith.cmpi eq, %c16_i32, %c0_i32_6 : i32
    %c1_i32 = arith.constant 1 : i32
    %9 = arith.select %8, %c1_i32, %c16_i32 : i32
    %10 = vector.broadcast %9 : i32 to vector<1x128xi32>
    %11 = arith.remsi %7, %10 : vector<1x128xi32>
    %c0_i32_7 = arith.constant 0 : i32
    %12 = vector.broadcast %c0_i32_7 : i32 to vector<1x128xi32>
    %13 = arith.cmpi ne, %11, %12 : vector<1x128xi32>
    %c0_i32_8 = arith.constant 0 : i32
    %14 = vector.broadcast %c0_i32_8 : i32 to vector<1x128xi32>
    %15 = arith.cmpi slt, %11, %14 : vector<1x128xi32>
    %c0_i32_9 = arith.constant 0 : i32
    %16 = arith.cmpi slt, %9, %c0_i32_9 : i32
    %17 = vector.broadcast %16 : i1 to vector<1x128xi1>
    %18 = vector.broadcast %17 : vector<1x128xi1> to vector<1x128xi1>
    %19 = arith.xori %15, %18 : vector<1x128xi1>
    %20 = arith.andi %19, %13 : vector<1x128xi1>
    %21 = vector.broadcast %9 : i32 to vector<1x128xi32>
    %22 = arith.addi %11, %21 : vector<1x128xi32>
    %23 = arith.select %20, %22, %11 : vector<1x128xi1>, vector<1x128xi32>
    %c4_i32 = arith.constant 4 : i32
    %24 = vector.broadcast %c4_i32 : i32 to vector<1x128xi32>
    %25 = arith.cmpi sge, %23, %24 : vector<1x128xi32>
    %c8_i32 = arith.constant 8 : i32
    %26 = vector.broadcast %c8_i32 : i32 to vector<1x128xi32>
    %27 = arith.cmpi slt, %23, %26 : vector<1x128xi32>
    %28 = arith.andi %25, %27 : vector<1x128xi1>
    %c4_i32_10 = arith.constant 4 : i32
    %29 = vector.broadcast %c4_i32_10 : i32 to vector<1x128xi32>
    %30 = arith.cmpi slt, %23, %29 : vector<1x128xi32>
    %c9_i32 = arith.constant 9 : i32
    %31 = vector.broadcast %c9_i32 : i32 to vector<1x128xi32>
    %32 = arith.cmpi slt, %23, %31 : vector<1x128xi32>
    %c1_i32_11 = arith.constant 1 : i32
    %c2_i32 = arith.constant 2 : i32
    %33 = vector.broadcast %c1_i32_11 : i32 to vector<1x128xi32>
    %34 = vector.broadcast %c2_i32 : i32 to vector<1x128xi32>
    %35 = arith.select %32, %33, %34 : vector<1x128xi1>, vector<1x128xi32>
    %c0_i32_12 = arith.constant 0 : i32
    %36 = vector.broadcast %c0_i32_12 : i32 to vector<1x128xi32>
    %37 = arith.select %30, %36, %35 : vector<1x128xi1>, vector<1x128xi32>
    %38 = arith.sitofp %37 : vector<1x128xi32> to vector<1x128xf32>
    %39 = vector.broadcast %38 : vector<1x128xf32> to vector<32x128xf32>
    %40 = arith.cmpf oeq, %6, %39 : vector<32x128xf32>
    %41 = arith.extui %40 : vector<32x128xi1> to vector<32x128xi32>
    %42 = arith.sitofp %41 : vector<32x128xi32> to vector<32x128xf32>
    %cst = arith.constant -1.000000e+30 : f32
    %43 = vector.shape_cast %28 : vector<1x128xi1> to vector<1x128xi1>
    %44 = vector.broadcast %43 : vector<1x128xi1> to vector<32x128xi1>
    %45 = vector.broadcast %cst : f32 to vector<32x128xf32>
    %46 = arith.select %44, %3, %45 : vector<32x128xi1>, vector<32x128xf32>
    %c1_i32_13 = arith.constant 1 : i32
    %47 = tpu.dynamic_rotate %46 by %c1_i32_13 dim 1 : vector<32x128xf32>, i32 -> vector<32x128xf32>
    %48 = arith.maximumf %46, %47 : vector<32x128xf32>
    %c127_i32 = arith.constant 127 : i32
    %49 = tpu.dynamic_rotate %46 by %c127_i32 dim 1 : vector<32x128xf32>, i32 -> vector<32x128xf32>
    %50 = arith.maximumf %48, %49 : vector<32x128xf32>
    %c3_i32 = arith.constant 3 : i32
    %51 = tpu.dynamic_rotate %50 by %c3_i32 dim 1 : vector<32x128xf32>, i32 -> vector<32x128xf32>
    %52 = arith.maximumf %50, %51 : vector<32x128xf32>
    %c125_i32 = arith.constant 125 : i32
    %53 = tpu.dynamic_rotate %50 by %c125_i32 dim 1 : vector<32x128xf32>, i32 -> vector<32x128xf32>
    %54 = arith.maximumf %52, %53 : vector<32x128xf32>
    %55 = arith.subf %3, %54 : vector<32x128xf32>
    %cst_14 = arith.constant -1.000000e+30 : f32
    %56 = vector.shape_cast %28 : vector<1x128xi1> to vector<1x128xi1>
    %57 = vector.broadcast %56 : vector<1x128xi1> to vector<32x128xi1>
    %58 = vector.broadcast %cst_14 : f32 to vector<32x128xf32>
    %59 = arith.select %57, %55, %58 : vector<32x128xi1>, vector<32x128xf32>
    %60 = math.exp %59 : vector<32x128xf32>
    %c1_i32_15 = arith.constant 1 : i32
    %61 = tpu.dynamic_rotate %60 by %c1_i32_15 dim 1 : vector<32x128xf32>, i32 -> vector<32x128xf32>
    %62 = arith.addf %60, %61 : vector<32x128xf32>
    %c127_i32_16 = arith.constant 127 : i32
    %63 = tpu.dynamic_rotate %60 by %c127_i32_16 dim 1 : vector<32x128xf32>, i32 -> vector<32x128xf32>
    %64 = arith.addf %62, %63 : vector<32x128xf32>
    %c3_i32_17 = arith.constant 3 : i32
    %65 = tpu.dynamic_rotate %64 by %c3_i32_17 dim 1 : vector<32x128xf32>, i32 -> vector<32x128xf32>
    %66 = arith.addf %64, %65 : vector<32x128xf32>
    %c125_i32_18 = arith.constant 125 : i32
    %67 = tpu.dynamic_rotate %64 by %c125_i32_18 dim 1 : vector<32x128xf32>, i32 -> vector<32x128xf32>
    %68 = arith.addf %66, %67 : vector<32x128xf32>
    %cst_19 = arith.constant 1.000000e+00 : f32
    %69 = vector.shape_cast %28 : vector<1x128xi1> to vector<1x128xi1>
    %70 = vector.broadcast %69 : vector<1x128xi1> to vector<32x128xi1>
    %71 = vector.broadcast %cst_19 : f32 to vector<32x128xf32>
    %72 = arith.select %70, %68, %71 : vector<32x128xi1>, vector<32x128xf32>
    %73 = arith.subf %3, %54 : vector<32x128xf32>
    %74 = math.log %72 : vector<32x128xf32>
    %75 = arith.subf %73, %74 : vector<32x128xf32>
    %cst_20 = arith.constant 0.000000e+00 : f32
    %76 = vector.shape_cast %28 : vector<1x128xi1> to vector<1x128xi1>
    %77 = vector.broadcast %76 : vector<1x128xi1> to vector<32x128xi1>
    %78 = vector.broadcast %cst_20 : f32 to vector<32x128xf32>
    %79 = arith.select %77, %75, %78 : vector<32x128xi1>, vector<32x128xf32>
    %80 = arith.divf %60, %72 : vector<32x128xf32>
    %81 = vector.shape_cast %28 : vector<1x128xi1> to vector<1x128xi1>
    %82 = vector.broadcast %81 : vector<1x128xi1> to vector<32x128xi1>
    %83 = arith.select %82, %80, %3 : vector<32x128xi1>, vector<32x128xf32>
    %84 = arith.subf %4, %83 : vector<32x128xf32>
    %85 = arith.mulf %84, %84 : vector<32x128xf32>
    %c0_21 = arith.constant 0 : index
    %c0_22 = arith.constant 0 : index
    %86 = vector.load %arg12[%c0_21, %c0_22] : memref<8x128xf32, #tpu.memory_space<vmem>>, vector<8x128xf32>
    %87 = arith.mulf %85, %42 : vector<32x128xf32>
    %88 = vector.shape_cast %87 : vector<32x128xf32> to vector<4x8x128xf32>
    %cst_23 = arith.constant dense<0.000000e+00> : vector<8x128xf32>
    %89 = vector.multi_reduction <add>, %88, %cst_23 [0] : vector<4x8x128xf32> to vector<8x128xf32>
    %90 = arith.addf %86, %89 : vector<8x128xf32>
    %c0_24 = arith.constant 0 : index
    %c0_25 = arith.constant 0 : index
    %91 = vector.load %arg12[%c0_24, %c0_25] : memref<8x128xf32, #tpu.memory_space<vmem>>, vector<8x128xf32>
    tpu.vector_store %arg12[%c0_24, %c0_25], %90 {strides = array<i32>} : memref<8x128xf32, #tpu.memory_space<vmem>>, vector<8x128xf32>,
    %c0_26 = arith.constant 0 : index
    %c0_27 = arith.constant 0 : index
    %92 = vector.load %arg13[%c0_26, %c0_27] : memref<8x128xf32, #tpu.memory_space<vmem>>, vector<8x128xf32>
    %93 = vector.shape_cast %42 : vector<32x128xf32> to vector<4x8x128xf32>
    %cst_28 = arith.constant dense<0.000000e+00> : vector<8x128xf32>
    %94 = vector.multi_reduction <add>, %93, %cst_28 [0] : vector<4x8x128xf32> to vector<8x128xf32>
    %95 = arith.addf %92, %94 : vector<8x128xf32>
    %c0_29 = arith.constant 0 : index
    %c0_30 = arith.constant 0 : index
    %96 = vector.load %arg13[%c0_29, %c0_30] : memref<8x128xf32, #tpu.memory_space<vmem>>, vector<8x128xf32>
    tpu.vector_store %arg13[%c0_29, %c0_30], %95 {strides = array<i32>} : memref<8x128xf32, #tpu.memory_space<vmem>>, vector<8x128xf32>,
    %c0_31 = arith.constant 0 : index
    %c0_32 = arith.constant 0 : index
    %97 = vector.load %arg14[%c0_31, %c0_32] : memref<8x128xf32, #tpu.memory_space<vmem>>, vector<8x128xf32>
    %98 = arith.mulf %4, %79 : vector<32x128xf32>
    %cst_33 = arith.constant 0.000000e+00 : f32
    %99 = vector.broadcast %cst_33 : f32 to vector<32x128xf32>
    %100 = arith.subf %99, %98 : vector<32x128xf32>
    %101 = arith.mulf %100, %42 : vector<32x128xf32>
    %102 = vector.shape_cast %101 : vector<32x128xf32> to vector<4x8x128xf32>
    %cst_34 = arith.constant dense<0.000000e+00> : vector<8x128xf32>
    %103 = vector.multi_reduction <add>, %102, %cst_34 [0] : vector<4x8x128xf32> to vector<8x128xf32>
    %104 = arith.addf %97, %103 : vector<8x128xf32>
    %c0_35 = arith.constant 0 : index
    %c0_36 = arith.constant 0 : index
    %105 = vector.load %arg14[%c0_35, %c0_36] : memref<8x128xf32, #tpu.memory_space<vmem>>, vector<8x128xf32>
    tpu.vector_store %arg14[%c0_35, %c0_36], %104 {strides = array<i32>} : memref<8x128xf32, #tpu.memory_space<vmem>>, vector<8x128xf32>,
    %c1_i32_37 = arith.constant 1 : i32
    %106 = arith.muli %arg0, %c1_i32_37 : i32
    %107 = arith.addi %106, %arg1 : i32
    %c0_38 = arith.constant 0 : index
    %c0_39 = arith.constant 0 : index
    %108 = vector.load %arg5[%c0_38, %c0_39] : memref<8x128xf32, #tpu.memory_space<vmem>>, vector<8x128xf32>
    %c0_40 = arith.constant 0 : index
    %c0_41 = arith.constant 0 : index
    %109 = vector.load %arg6[%c0_40, %c0_41] : memref<8x128xf32, #tpu.memory_space<vmem>>, vector<8x128xf32>
    %110 = tpu.iota {dimensions = array<i32: 0>} : vector<8x128xi32>
    %111 = tpu.iota {dimensions = array<i32: 1>} : vector<8x128xi32>
    %c1024_i32 = arith.constant 1024 : i32
    %112 = arith.muli %107, %c1024_i32 : i32
    %c128_i32 = arith.constant 128 : i32
    %113 = vector.broadcast %c128_i32 : i32 to vector<8x128xi32>
    %114 = arith.muli %110, %113 : vector<8x128xi32>
    %115 = vector.broadcast %112 : i32 to vector<8x128xi32>
    %116 = arith.addi %115, %114 : vector<8x128xi32>
    %117 = arith.addi %116, %111 : vector<8x128xi32>
    %c10_i32 = arith.constant 10 : i32
    %118 = vector.broadcast %c10_i32 : i32 to vector<8x128xi32>
    %119 = arith.cmpi slt, %117, %118 : vector<8x128xi32>
    %cst_42 = arith.constant 0.000000e+00 : f32
    %120 = vector.broadcast %cst_42 : f32 to vector<8x128xf32>
    %121 = arith.maximumf %108, %120 : vector<8x128xf32>
    %122 = arith.mulf %108, %109 : vector<8x128xf32>
    %123 = arith.subf %121, %122 : vector<8x128xf32>
    %124 = math.absf %108 : vector<8x128xf32>
    %cst_43 = arith.constant 0.000000e+00 : f32
    %125 = vector.broadcast %cst_43 : f32 to vector<8x128xf32>
    %126 = arith.subf %125, %124 : vector<8x128xf32>
    %127 = math.exp %126 : vector<8x128xf32>
    %cst_44 = arith.constant 1.000000e+00 : f32
    %128 = vector.broadcast %cst_44 : f32 to vector<8x128xf32>
    %129 = arith.addf %128, %127 : vector<8x128xf32>
    %130 = math.log %129 : vector<8x128xf32>
    %131 = arith.addf %123, %130 : vector<8x128xf32>
    %c0_45 = arith.constant 0 : index
    %c0_46 = arith.constant 0 : index
    %132 = vector.load %arg15[%c0_45, %c0_46] : memref<8x128xf32, #tpu.memory_space<vmem>>, vector<8x128xf32>
    %cst_47 = arith.constant 0.000000e+00 : f32
    %133 = vector.broadcast %cst_47 : f32 to vector<8x128xf32>
    %134 = arith.select %119, %131, %133 : vector<8x128xi1>, vector<8x128xf32>
    %135 = vector.shape_cast %134 : vector<8x128xf32> to vector<1x8x128xf32>
    %cst_48 = arith.constant dense<0.000000e+00> : vector<8x128xf32>
    %136 = vector.multi_reduction <add>, %135, %cst_48 [0] : vector<1x8x128xf32> to vector<8x128xf32>
    %137 = arith.addf %132, %136 : vector<8x128xf32>
    %c0_49 = arith.constant 0 : index
    %c0_50 = arith.constant 0 : index
    %138 = vector.load %arg15[%c0_49, %c0_50] : memref<8x128xf32, #tpu.memory_space<vmem>>, vector<8x128xf32>
    tpu.vector_store %arg15[%c0_49, %c0_50], %137 {strides = array<i32>} : memref<8x128xf32, #tpu.memory_space<vmem>>, vector<8x128xf32>,
    %c0_51 = arith.constant 0 : index
    %c0_52 = arith.constant 0 : index
    %139 = vector.load %arg7[%c0_51, %c0_52] : memref<8x128xf32, #tpu.memory_space<vmem>>, vector<8x128xf32>
    %c0_53 = arith.constant 0 : index
    %c0_54 = arith.constant 0 : index
    %140 = vector.load %arg8[%c0_53, %c0_54] : memref<8x128xf32, #tpu.memory_space<vmem>>, vector<8x128xf32>
    %141 = arith.subf %139, %140 : vector<8x128xf32>
    %c0_55 = arith.constant 0 : index
    %c0_56 = arith.constant 0 : index
    %142 = vector.load %arg16[%c0_55, %c0_56] : memref<8x128xf32, #tpu.memory_space<vmem>>, vector<8x128xf32>
    %143 = arith.mulf %141, %141 : vector<8x128xf32>
    %144 = vector.shape_cast %143 : vector<8x128xf32> to vector<1x8x128xf32>
    %cst_57 = arith.constant dense<0.000000e+00> : vector<8x128xf32>
    %145 = vector.multi_reduction <add>, %144, %cst_57 [0] : vector<1x8x128xf32> to vector<8x128xf32>
    %146 = arith.addf %142, %145 : vector<8x128xf32>
    %c0_58 = arith.constant 0 : index
    %c0_59 = arith.constant 0 : index
    %147 = vector.load %arg16[%c0_58, %c0_59] : memref<8x128xf32, #tpu.memory_space<vmem>>, vector<8x128xf32>
    tpu.vector_store %arg16[%c0_58, %c0_59], %146 {strides = array<i32>} : memref<8x128xf32, #tpu.memory_space<vmem>>, vector<8x128xf32>,
    %c0_60 = arith.constant 0 : index
    %c0_61 = arith.constant 0 : index
    %148 = vector.load %arg9[%c0_60, %c0_61] : memref<8x128xf32, #tpu.memory_space<vmem>>, vector<8x128xf32>
    %c0_62 = arith.constant 0 : index
    %c0_63 = arith.constant 0 : index
    %149 = vector.load %arg10[%c0_62, %c0_63] : memref<8x128xf32, #tpu.memory_space<vmem>>, vector<8x128xf32>
    %150 = arith.subf %148, %149 : vector<8x128xf32>
    %c0_64 = arith.constant 0 : index
    %c0_65 = arith.constant 0 : index
    %151 = vector.load %arg17[%c0_64, %c0_65] : memref<8x128xf32, #tpu.memory_space<vmem>>, vector<8x128xf32>
    %152 = arith.mulf %150, %150 : vector<8x128xf32>
    %153 = vector.shape_cast %152 : vector<8x128xf32> to vector<1x8x128xf32>
    %cst_66 = arith.constant dense<0.000000e+00> : vector<8x128xf32>
    %154 = vector.multi_reduction <add>, %153, %cst_66 [0] : vector<1x8x128xf32> to vector<8x128xf32>
    %155 = arith.addf %151, %154 : vector<8x128xf32>
    %c0_67 = arith.constant 0 : index
    %c0_68 = arith.constant 0 : index
    %156 = vector.load %arg17[%c0_67, %c0_68] : memref<8x128xf32, #tpu.memory_space<vmem>>, vector<8x128xf32>
    tpu.vector_store %arg17[%c0_67, %c0_68], %155 {strides = array<i32>} : memref<8x128xf32, #tpu.memory_space<vmem>>, vector<8x128xf32>,
    %c0_i32_69 = arith.constant 0 : i32
    %157 = arith.cmpi eq, %arg1, %c0_i32_69 : i32
    %158 = arith.extui %157 : i1 to i32
    %c0_i32_70 = arith.constant 0 : i32
    %159 = arith.cmpi ne, %158, %c0_i32_70 : i32
    scf.if %159 {
      %c0_71 = arith.constant 0 : index
      %c0_72 = arith.constant 0 : index
      %160 = vector.load %arg12[%c0_71, %c0_72] : memref<8x128xf32, #tpu.memory_space<vmem>>, vector<8x128xf32>
      %c0_73 = arith.constant 0 : index
      %c0_74 = arith.constant 0 : index
      %c0_75 = arith.constant 0 : index
      %161 = vector.load %arg11[%c0_73, %c0_74, %c0_75] : memref<1x48x128xf32, #tpu.memory_space<vmem>>, vector<1x8x128xf32>
      %162 = vector.shape_cast %161 : vector<1x8x128xf32> to vector<8x128xf32>
      %163 = vector.shape_cast %160 : vector<8x128xf32> to vector<1x8x128xf32>
      tpu.vector_store %arg11[%c0_73, %c0_74, %c0_75], %163 {strides = array<i32>} : memref<1x48x128xf32, #tpu.memory_space<vmem>>, vector<1x8x128xf32>,
      %c0_76 = arith.constant 0 : index
      %c0_77 = arith.constant 0 : index
      %164 = vector.load %arg13[%c0_76, %c0_77] : memref<8x128xf32, #tpu.memory_space<vmem>>, vector<8x128xf32>
      %c0_78 = arith.constant 0 : index
      %c8 = arith.constant 8 : index
      %c0_79 = arith.constant 0 : index
      %165 = vector.load %arg11[%c0_78, %c8, %c0_79] : memref<1x48x128xf32, #tpu.memory_space<vmem>>, vector<1x8x128xf32>
      %166 = vector.shape_cast %165 : vector<1x8x128xf32> to vector<8x128xf32>
      %167 = vector.shape_cast %164 : vector<8x128xf32> to vector<1x8x128xf32>
      tpu.vector_store %arg11[%c0_78, %c8, %c0_79], %167 {strides = array<i32>} : memref<1x48x128xf32, #tpu.memory_space<vmem>>, vector<1x8x128xf32>,
      %c0_80 = arith.constant 0 : index
      %c0_81 = arith.constant 0 : index
      %168 = vector.load %arg14[%c0_80, %c0_81] : memref<8x128xf32, #tpu.memory_space<vmem>>, vector<8x128xf32>
      %c0_82 = arith.constant 0 : index
      %c16 = arith.constant 16 : index
      %c0_83 = arith.constant 0 : index
      %169 = vector.load %arg11[%c0_82, %c16, %c0_83] : memref<1x48x128xf32, #tpu.memory_space<vmem>>, vector<1x8x128xf32>
      %170 = vector.shape_cast %169 : vector<1x8x128xf32> to vector<8x128xf32>
      %171 = vector.shape_cast %168 : vector<8x128xf32> to vector<1x8x128xf32>
      tpu.vector_store %arg11[%c0_82, %c16, %c0_83], %171 {strides = array<i32>} : memref<1x48x128xf32, #tpu.memory_space<vmem>>, vector<1x8x128xf32>,
      %c0_84 = arith.constant 0 : index
      %c0_85 = arith.constant 0 : index
      %172 = vector.load %arg15[%c0_84, %c0_85] : memref<8x128xf32, #tpu.memory_space<vmem>>, vector<8x128xf32>
      %c0_86 = arith.constant 0 : index
      %c24 = arith.constant 24 : index
      %c0_87 = arith.constant 0 : index
      %173 = vector.load %arg11[%c0_86, %c24, %c0_87] : memref<1x48x128xf32, #tpu.memory_space<vmem>>, vector<1x8x128xf32>
      %174 = vector.shape_cast %173 : vector<1x8x128xf32> to vector<8x128xf32>
      %175 = vector.shape_cast %172 : vector<8x128xf32> to vector<1x8x128xf32>
      tpu.vector_store %arg11[%c0_86, %c24, %c0_87], %175 {strides = array<i32>} : memref<1x48x128xf32, #tpu.memory_space<vmem>>, vector<1x8x128xf32>,
      %c0_88 = arith.constant 0 : index
      %c0_89 = arith.constant 0 : index
      %176 = vector.load %arg16[%c0_88, %c0_89] : memref<8x128xf32, #tpu.memory_space<vmem>>, vector<8x128xf32>
      %c0_90 = arith.constant 0 : index
      %c32 = arith.constant 32 : index
      %c0_91 = arith.constant 0 : index
      %177 = vector.load %arg11[%c0_90, %c32, %c0_91] : memref<1x48x128xf32, #tpu.memory_space<vmem>>, vector<1x8x128xf32>
      %178 = vector.shape_cast %177 : vector<1x8x128xf32> to vector<8x128xf32>
      %179 = vector.shape_cast %176 : vector<8x128xf32> to vector<1x8x128xf32>
      tpu.vector_store %arg11[%c0_90, %c32, %c0_91], %179 {strides = array<i32>} : memref<1x48x128xf32, #tpu.memory_space<vmem>>, vector<1x8x128xf32>,
      %c0_92 = arith.constant 0 : index
      %c0_93 = arith.constant 0 : index
      %180 = vector.load %arg17[%c0_92, %c0_93] : memref<8x128xf32, #tpu.memory_space<vmem>>, vector<8x128xf32>
      %c0_94 = arith.constant 0 : index
      %c40 = arith.constant 40 : index
      %c0_95 = arith.constant 0 : index
      %181 = vector.load %arg11[%c0_94, %c40, %c0_95] : memref<1x48x128xf32, #tpu.memory_space<vmem>>, vector<1x8x128xf32>
      %182 = vector.shape_cast %181 : vector<1x8x128xf32> to vector<8x128xf32>
      %183 = vector.shape_cast %180 : vector<8x128xf32> to vector<1x8x128xf32>
      tpu.vector_store %arg11[%c0_94, %c40, %c0_95], %183 {strides = array<i32>} : memref<1x48x128xf32, #tpu.memory_space<vmem>>, vector<1x8x128xf32>,
    } else {
    }
    return
  }
  func.func @transform_0(%arg0: i32, %arg1: i32) -> (i32, i32) {
    %c1_i32 = arith.constant 1 : i32
    %0 = arith.muli %arg0, %c1_i32 : i32
    %1 = arith.addi %0, %arg1 : i32
    %c0_i32 = arith.constant 0 : i32
    %c0_i32_0 = arith.constant 0 : i32
    return %1, %c0_i32 : i32, i32
  }
  func.func @transform_1(%arg0: i32, %arg1: i32) -> (i32, i32) {
    %c1_i32 = arith.constant 1 : i32
    %0 = arith.muli %arg0, %c1_i32 : i32
    %1 = arith.addi %0, %arg1 : i32
    %c0_i32 = arith.constant 0 : i32
    %c0_i32_0 = arith.constant 0 : i32
    return %1, %c0_i32 : i32, i32
  }
  func.func @transform_2(%arg0: i32, %arg1: i32) -> (i32, i32) {
    %c1_i32 = arith.constant 1 : i32
    %0 = arith.muli %arg0, %c1_i32 : i32
    %1 = arith.addi %0, %arg1 : i32
    %c0_i32 = arith.constant 0 : i32
    %c0_i32_0 = arith.constant 0 : i32
    return %1, %c0_i32 : i32, i32
  }
  func.func @transform_3(%arg0: i32, %arg1: i32) -> (i32, i32) {
    %c1_i32 = arith.constant 1 : i32
    %0 = arith.muli %arg0, %c1_i32 : i32
    %1 = arith.addi %0, %arg1 : i32
    %c0_i32 = arith.constant 0 : i32
    %c0_i32_0 = arith.constant 0 : i32
    return %1, %c0_i32 : i32, i32
  }
  func.func @transform_4(%arg0: i32, %arg1: i32) -> (i32, i32) {
    %c1_i32 = arith.constant 1 : i32
    %0 = arith.muli %arg0, %c1_i32 : i32
    %1 = arith.addi %0, %arg1 : i32
    %c0_i32 = arith.constant 0 : i32
    %c0_i32_0 = arith.constant 0 : i32
    return %1, %c0_i32 : i32, i32
  }
  func.func @transform_5(%arg0: i32, %arg1: i32) -> (i32, i32) {
    %c1_i32 = arith.constant 1 : i32
    %0 = arith.muli %arg0, %c1_i32 : i32
    %1 = arith.addi %0, %arg1 : i32
    %c0_i32 = arith.constant 0 : i32
    %c0_i32_0 = arith.constant 0 : i32
    return %1, %c0_i32 : i32, i32
  }
  func.func @transform_6(%arg0: i32, %arg1: i32) -> (i32, i32) {
    %c1_i32 = arith.constant 1 : i32
    %0 = arith.muli %arg0, %c1_i32 : i32
    %1 = arith.addi %0, %arg1 : i32
    %c0_i32 = arith.constant 0 : i32
    %c0_i32_0 = arith.constant 0 : i32
    return %1, %c0_i32 : i32, i32
  }
  func.func @transform_7(%arg0: i32, %arg1: i32) -> (i32, i32) {
    %c1_i32 = arith.constant 1 : i32
    %0 = arith.muli %arg0, %c1_i32 : i32
    %1 = arith.addi %0, %arg1 : i32
    %c0_i32 = arith.constant 0 : i32
    %c0_i32_0 = arith.constant 0 : i32
    return %1, %c0_i32 : i32, i32
  }
  func.func @transform_8(%arg0: i32, %arg1: i32) -> (i32, i32) {
    %c1_i32 = arith.constant 1 : i32
    %0 = arith.muli %arg0, %c1_i32 : i32
    %1 = arith.addi %0, %arg1 : i32
    %c0_i32 = arith.constant 0 : i32
    %c0_i32_0 = arith.constant 0 : i32
    return %1, %c0_i32 : i32, i32
  }
  func.func @transform_9(%arg0: i32, %arg1: i32) -> (i32, i32, i32) {
    %c0_i32 = arith.constant 0 : i32
    %c0_i32_0 = arith.constant 0 : i32
    %c0_i32_1 = arith.constant 0 : i32
    return %arg0, %c0_i32, %c0_i32_0 : i32, i32, i32
  }
}

</mosaic_0001>

<bundles_post_ra>
// kernel: tpu_custom_call.1
= control target key start
LH: loop header
LB: loop body
LE: loop exit
PB: predicated region body
PF: predicated region fallthrough
CT: control target
= control target key end

     0   :  { %s2506_s0 = inlined_call_operand.hbm [shape: f32[64,128], index: 0, kind: input, shape index: {}]   ;;  %s2507_s1 = inlined_call_operand.hbm [shape: f32[64,128], index: 1, kind: input, shape index: {}]   ;;  %s2508_s2 = inlined_call_operand.hbm [shape: s8[64,128], index: 2, kind: input, shape index: {}]   ;;  %s2509_s3 = inlined_call_operand.hbm [shape: f32[16,128], index: 3, kind: input, shape index: {}]   ;;  %s2510_s4 = inlined_call_operand.hbm [shape: f32[16,128], index: 4, kind: input, shape index: {}]   ;;  %s2511_s5 = inlined_call_operand.vmem [shape: f32[16,128], index: 5, kind: input, shape index: {}]   ;;  %s2512_s6 = inlined_call_operand.hbm [shape: f32[16,128], index: 6, kind: input, shape index: {}]   ;;  %s2513_s7 = inlined_call_operand.hbm [shape: f32[16,128], index: 7, kind: input, shape index: {}]   ;;  %s2514_s8 = inlined_call_operand.hbm [shape: f32[16,128], index: 8, kind: input, shape index: {}]   ;;  %s2515_s9 = inlined_call_operand.hbm [shape: f32[2,48,128], index: 9, kind: output, shape index: {}]  }
   0x1   :  { %2536 = sst [smem:[#allocation38_spill]] %s2506_s0 }
   0x2   :  { %2537 = sst [smem:[#allocation39_spill]] %s2507_s1 }
   0x3   :  { %2538 = sst [smem:[#allocation40_spill]] %s2509_s3 }
   0x4   :  { %2539 = sst [smem:[#allocation41_spill]] %s2511_s5 }
   0x5   :  { %2540 = sst [smem:[#allocation42_spill]] %s2512_s6 }
   0x6   :  { %2541 = sst [smem:[#allocation43_spill]] %s2515_s9 }
   0x7   :  { %14 = vsyncpa [#allocation9], 0 }
   0x8   :  { %16 = vsyncpa [#allocation9 + $0x1], 0 }
   0x9   :  { %17 = vsyncpa [#allocation12], 0 }
   0xa   :  { %19 = vsyncpa [#allocation12 + $0x1], 0 }
   0xb   :  { %20 = vsyncpa [#allocation15], 0 }
   0xc   :  { %22 = vsyncpa [#allocation15 + $0x1], 0 }
   0xd   :  { %23 = vsyncpa [#allocation18], 0 }
   0xe   :  { %25 = vsyncpa [#allocation18 + $0x1], 0 }
   0xf   :  { %26 = vsyncpa [#allocation21], 0 }
  0x10   :  { %28 = vsyncpa [#allocation21 + $0x1], 0 }
  0x11   :  { %29 = vsyncpa [#allocation10], 0 }
  0x12   :  { %31 = vsyncpa [#allocation10 + $0x1], 0  ;;  %s1843_s30 = smov 0   ;;  %s1845_s10 = smov 0  }
  0x13   :  { %s1847_s11 = smov 0   ;;  %s1849_s12 = smov 0  }
  0x14   :  { %s1851_s13 = smov 0   ;;  %s1853_s14 = smov 0  }
  0x15 LB: > { %2542 = sst [smem:[#allocation29_spill]] %s1752_s30  ;;  %s1874_s15 = sadd.s32 4294967295, %s1772_s14   ;;  %s1772_s14 = sphi %s1853_s14, %s37_s14   ;;  %s1768_s13 = sphi %s1851_s13, %s2597_s13   ;;  %s1764_s12 = sphi %s1849_s12, %s2596_s12   ;;  %s1760_s11 = sphi %s1847_s11, %s2595_s11   ;;  %s1756_s10 = sphi %s1845_s10, %s2599_s10   ;;  %s1752_s30 = sphi %s1843_s30, %s2598_s30  }
  0x16   : > { %2543 = sst [smem:[#allocation30_spill]] %s1760_s11  ;;  %s1253_s16 = sadd.s32 4294967294, %s1772_s14  }
  0x17   : > { %2544 = sst [smem:[#allocation31_spill]] %s1764_s12  ;;  %s49_s17 = sadd.s32 1, %s1768_s13 }
  0x18   : > { %2545 = sst [smem:[#allocation32_spill]] %s1768_s13  ;;  %s58_s18 = sadd.s32 1, %s1760_s11 }
  0x19   : > { %2546 = sst [smem:[#allocation33_spill]] %s1772_s14  ;;  %p51_p0 = scmp.ge.s32.totalorder %s49_s17, 2 }
  0x1a   : > { %p65_p1 = scmp.ne.s32.totalorder %s1760_s11, %s1756_s10  ;;  %p66_p2 = scmp.eq.s32.totalorder %s1772_s14, 0 }
  0x1b   : > { %p71_p3 = scmp.ne.s32.totalorder %s1756_s10, %s1752_s30  ;;  %s2601_s17 = smov (%p51_p0, %s49_s17), 0 }
  0x1c   : > { %2547 = sst [smem:[#allocation34_spill]] %s2601_s17  ;;  %p1886_p4 = por %p66_p2, %p65_p1 }
  0x1d   : > { %p72_p5 = scmp.eq.s32.totalorder %s1874_s15, 0  ;;  %s55_s20 = ssub.s32 %s1768_s13, %s2601_s17 }
  0x1e   : > { %p319_p6 = scmp.eq.s32.totalorder %s1874_s15, 1  ;;  %p56_p7 = scmp.eq.s32.totalorder %s55_s20, 0 }
  0x1f   : > { %p1894_p8 = por %p72_p5, %p71_p3  ;;  %p325_p10 = scmp.eq.s32.totalorder %s1253_s16, 1 }
  0x20   : > { %p1898_p9 = por %p319_p6, %p65_p1  ;;  %p1346_p13 = scmp.lt.s32.totalorder %s1772_s14, 2 }
  0x21   : > { %s2549_s21 = scalar_select %p1894_p8, 1, 0 }
  0x22   : > { %s2550_s22 = scalar_select %p1898_p9, 1, 0 }
  0x23   : > { %s1903_s23 = scalar_select %p56_p7, %s1760_s11, %s58_s18  }
  0x24   : > { %2551 = sst [smem:[#allocation35_spill]] %s2550_s22  ;;  %p1905_p11 = por %p325_p10, %p71_p3 }
  0x25   : > { %2552 = sst [smem:[#allocation36_spill]] %s1903_s23  ;;  %s1912_s25 = sand.u32 1, %s1760_s11  }
  0x26   : > { %s2553_s24 = scalar_select %p1905_p11, 1, 0 }
  0x27   : > { %s2519_s26 = sshll.u32 %s1912_s25, 5  ;;  %s2518_s27 = sshll.u32 %s1768_s13, 9 }
  0x28   : > { %2554 = sst [smem:[#allocation37_spill]] %s2553_s24  ;;  %p1918_p0 = pnand %p1346_p13, %p1886_p4 }
  0x29   : > { %s1923_s29 = sand.u32 1, %s1772_s14   ;;  %s2556_s1 = sld [smem:[#allocation39_spill]] }
  0x2a   : > { %s2555_s28 = scalar_select %p1918_p0, 1, 0 }
  0x2b   : > { %s371_s19 = scalar_lea.vmem [#allocation11], %s2519_s26  ;;  %p1943_p4 = pneg %p1918_p0 }
  0x2c   : > { %s379_s17 = sshll.u32 %s371_s19, 4  ;;  %s1935_s17 = int_to_ptr.vmem [resolvable:$true] %s379_s17 }
  0x2f   : > { %s1930_s20 = scalar_lea.hbm %s2556_s1, %s2518_s27  ;;  %s1439_s19 = scalar_lea.hbm %s2556_s1, 1024 }
  0x30   : > { %s1434_s11 = scalar_lea.hbm %s1930_s20, 512  ;;  %p1440_p7 = scmp.lt.u32.totalorder %s1930_s20, %s2556_s1 }
  0x31   : > { %p1435_p3 = scmp.ne.s32.totalorder %s1930_s20, %s1434_s11  ;;  %p1441_p10 = scmp.lt.u32.totalorder %s1439_s19, %s1434_s11 }
  0x32   : > { %p1443_p12 = scmp.lt.u32.totalorder %s1434_s11, %s1930_s20 }
  0x33   : > { %p1437_p5 = pnand %p1943_p4, %p1435_p3  ;;  %p1442_p13 = por %p1441_p10, %p1440_p7 }
  0x35   : > { %p1438_p6 = pneg %p1437_p5  ;;  %p1444_p1 = por %p1443_p12, %p1442_p13 }
  0x37   : > { %p1445_p2 = pnand %p1444_p1, %p1438_p6 }
  0x39   : > { %1448 = shalt.err (!%p1445_p2)
}
  0x3a   : > { %s1449_s23 = scalar_lea.vmem %s1935_s17, 512  ;;  %s1774_s27 = smov [#allocation11]  }
  0x3b   : > { %p1450_p3 = scmp.ne.s32.totalorder %s1935_s17, %s1449_s23  ;;  %s1454_s18 = sshll.u32 %s1774_s27, 4  ;;  %s1455_s18 = int_to_ptr.vmem [resolvable:$false] %s1454_s18 }
  0x3c   : > { %s1456_s24 = scalar_lea.vmem %s1455_s18, 1024  ;;  %p1457_p9 = scmp.lt.s32.totalorder %s1935_s17, %s1455_s18 }
  0x3d   : > { %p1452_p5 = pnand %p1450_p3, %p1943_p4  ;;  %p1458_p8 = scmp.lt.s32.totalorder %s1456_s24, %s1449_s23 }
  0x3f   : > { %p1453_p11 = pneg %p1452_p5  ;;  %p1459_p7 = por %p1458_p8, %p1457_p9 }
  0x41   : > { %p1460_p10 = pnand %p1459_p7, %p1453_p11 }
  0x43   : > { %1463 = shalt.err (!%p1460_p10)
}
  0x44   : > { %s2524_s11 = smov 128   ;;  %s2525_s26 = smov 8  }
  0x45   : > { %s2558_s23 = scalar_lea.sflag [#allocation12], %s1923_s29  ;;  %p2559_p8 = scmp.lt.s32.totalorder %s1772_s14, 3 }
  0x46   : > { %1323 = dma.hbm_to_vmem [thread:$0]  (!%p1918_p0), %s1930_s20, 512, %s1935_s17, %s2558_s23, %s2524_s11, %s2524_s11, %s2525_s26  }
  0x47   : > { %p2560_p9 = scmp.ge.s32.totalorder %s1772_s14, 1  ;;  %s1980_s27 = sshll.u32 %s1912_s25, 3 }
  0x48   : > { %s1983_s18 = sshll.u32 %s1768_s13, 7  ;;  %s2562_s3 = sld [smem:[#allocation40_spill]] }
  0x49   : > { %p1975_p11 = pnand %p2560_p9, %p2559_p8  ;;  %s412_s17 = scalar_lea.vmem [#allocation14], %s1980_s27 }
  0x4a   : > { %s420_s20 = sshll.u32 %s412_s17, 4  ;;  %s421_s20 = int_to_ptr.vmem [resolvable:$true] %s420_s20 }
  0x4b   : > { %s2561_s19 = scalar_select %p1975_p11, 1, 0 }
  0x4e   : > { %s1989_s30 = scalar_lea.hbm %s2562_s3, %s1983_s18  ;;  %s1469_s9 = scalar_lea.hbm %s2562_s3, 256 }
  0x4f   : > { %s1464_s11 = scalar_lea.hbm %s1989_s30, 128  ;;  %p1470_p6 = scmp.lt.u32.totalorder %s1989_s30, %s2562_s3 }
  0x50   : > { %p1465_p12 = scmp.ne.s32.totalorder %s1989_s30, %s1464_s11  ;;  %p1471_p13 = scmp.lt.u32.totalorder %s1469_s9, %s1464_s11 }
  0x51   : > { %p1473_p5 = scmp.lt.u32.totalorder %s1464_s11, %s1989_s30 }
  0x52   : > { %p1467_p1 = pnand %p1465_p12, %p1943_p4  ;;  %p1472_p3 = por %p1471_p13, %p1470_p6 }
  0x54   : > { %p1468_p2 = pneg %p1467_p1  ;;  %p1474_p7 = por %p1473_p5, %p1472_p3 }
  0x56   : > { %p1475_p10 = pnand %p1474_p7, %p1468_p2 }
  0x58   : > { %1478 = shalt.err (!%p1475_p10)
}
  0x59   : > { %s1479_s17 = scalar_lea.vmem %s421_s20, 128  ;;  %s1777_s23 = smov [#allocation14]  }
  0x5a   : > { %p1480_p8 = scmp.ne.s32.totalorder %s421_s20, %s1479_s17  ;;  %s1484_s22 = sshll.u32 %s1777_s23, 4  ;;  %s1485_s22 = int_to_ptr.vmem [resolvable:$false] %s1484_s22 }
  0x5b   : > { %s1486_s14 = scalar_lea.vmem %s1485_s22, 256  ;;  %p1487_p1 = scmp.lt.s32.totalorder %s421_s20, %s1485_s22 }
  0x5c   : > { %p1482_p9 = pnand %p1480_p8, %p1943_p4  ;;  %p1488_p11 = scmp.lt.s32.totalorder %s1486_s14, %s1479_s17 }
  0x5e   : > { %p1483_p12 = pneg %p1482_p9  ;;  %p1489_p0 = por %p1488_p11, %p1487_p1 }
  0x60   : > { %p1490_p6 = pnand %p1489_p0, %p1483_p12 }
  0x62   : > { %1493 = shalt.err (!%p1490_p6)
}
  0x63   : > { %p2563_p13 = scmp.ne.s32.totalorder %s2555_s28, 0  ;;  %s2564_s9 = scalar_lea.sflag [#allocation15], %s1923_s29 }
  0x64   : > { %s2565_s6 = sld [smem:[#allocation42_spill]]  ;;  %s459_s22 = scalar_lea.vmem [#allocation17], %s1980_s27 }
  0x65   : > { %1329 = dma.hbm_to_vmem [thread:$0]  (!%p2563_p13), %s1989_s30, 128, %s421_s20, %s2564_s9  }
  0x66   : > { %s467_s1 = sshll.u32 %s459_s22, 4  ;;  %s468_s1 = int_to_ptr.vmem [resolvable:$true] %s467_s1 }
  0x6a   : > { %s2016_s23 = scalar_lea.hbm %s2565_s6, %s1983_s18  ;;  %s1499_s20 = scalar_lea.hbm %s2565_s6, 256 }
  0x6b   : > { %s1494_s17 = scalar_lea.hbm %s2016_s23, 128  ;;  %p1500_p3 = scmp.lt.u32.totalorder %s2016_s23, %s2565_s6 }
  0x6c   : > { %p1495_p0 = scmp.ne.s32.totalorder %s2016_s23, %s1494_s17  ;;  %p1501_p5 = scmp.lt.u32.totalorder %s1499_s20, %s1494_s17 }
  0x6d   : > { %p1503_p10 = scmp.lt.u32.totalorder %s1494_s17, %s2016_s23 }
  0x6e   : > { %p1497_p11 = pnand %p1495_p0, %p1943_p4  ;;  %p1502_p7 = por %p1501_p5, %p1500_p3 }
  0x70   : > { %p1498_p2 = pneg %p1497_p11  ;;  %p1504_p8 = por %p1503_p10, %p1502_p7 }
  0x72   : > { %p1505_p9 = pnand %p1504_p8, %p1498_p2 }
  0x74   : > { %1508 = shalt.err (!%p1505_p9)
}
  0x75   : > { %s1509_s26 = scalar_lea.vmem %s468_s1, 128  ;;  %s1778_s22 = smov [#allocation17]  }
  0x76   : > { %p1510_p12 = scmp.ne.s32.totalorder %s468_s1, %s1509_s26  ;;  %s1514_s24 = sshll.u32 %s1778_s22, 4  ;;  %s1515_s24 = int_to_ptr.vmem [resolvable:$false] %s1514_s24 }
  0x77   : > { %s1516_s14 = scalar_lea.vmem %s1515_s24, 256  ;;  %p1517_p0 = scmp.lt.s32.totalorder %s468_s1, %s1515_s24 }
  0x78   : > { %p1512_p1 = pnand %p1510_p12, %p1943_p4  ;;  %p1518_p11 = scmp.lt.s32.totalorder %s1516_s14, %s1509_s26 }
  0x7a   : > { %p1513_p6 = pneg %p1512_p1  ;;  %p1519_p13 = por %p1518_p11, %p1517_p0 }
  0x7c   : > { %p1520_p3 = pnand %p1519_p13, %p1513_p6 }
  0x7e   : > { %1523 = shalt.err (!%p1520_p3)
}
  0x7f   : > { %p2566_p5 = scmp.ne.s32.totalorder %s2555_s28, 0  ;;  %s2567_s17 = scalar_lea.sflag [#allocation18], %s1923_s29 }
  0x80   : > { %s2568_s30 = sshll.u32 %s1768_s13, 9  ;;  %s2569_s0 = sld [smem:[#allocation38_spill]] }
  0x81   : > { %1335 = dma.hbm_to_vmem [thread:$0]  (!%p2566_p5), %s2016_s23, 128, %s468_s1, %s2567_s17  }
  0x82   : > { %s2570_s11 = sshll.u32 %s1912_s25, 5  ;;  %s2054_s6 = scalar_lea.hbm %s2508_s2, %s1983_s18 }
  0x83   : > { %s349_s26 = scalar_lea.vmem [#allocation8], %s2570_s11  ;;  %s346_s23 = scalar_lea.sflag [#allocation9], %s1912_s25 }
  0x84   : > { %s357_s22 = sshll.u32 %s349_s26, 4  ;;  %s2048_s22 = int_to_ptr.vmem [resolvable:$true] %s357_s22 }
  0x86   : > { %s2044_s24 = scalar_lea.hbm %s2569_s0, %s2568_s30  ;;  %s1529_s20 = scalar_lea.hbm %s2569_s0, 1024 }
  0x87   : > { %s1524_s1 = scalar_lea.hbm %s2044_s24, 512  ;;  %p1530_p10 = scmp.lt.u32.totalorder %s2044_s24, %s2569_s0 }
  0x88   : > { %p1525_p13 = scmp.ne.s32.totalorder %s2044_s24, %s1524_s1  ;;  %p1531_p8 = scmp.lt.u32.totalorder %s1529_s20, %s1524_s1 }
  0x89   : > { %p1533_p12 = scmp.lt.u32.totalorder %s1524_s1, %s2044_s24 }
  0x8a   : > { %p1527_p2 = pnand %p1525_p13, %p1943_p4  ;;  %p1532_p9 = por %p1531_p8, %p1530_p10 }
  0x8c   : > { %p1528_p7 = pneg %p1527_p2  ;;  %p1534_p1 = por %p1533_p12, %p1532_p9 }
  0x8e   : > { %p1535_p6 = pnand %p1534_p1, %p1528_p7 }
  0x90   : > { %1538 = shalt.err (!%p1535_p6)
}
  0x91   : > { %s1539_s3 = scalar_lea.vmem %s2048_s22, 512  ;;  %s1779_s26 = smov [#allocation8]  }
  0x92   : > { %p1540_p0 = scmp.ne.s32.totalorder %s2048_s22, %s1539_s3  ;;  %s1544_s14 = sshll.u32 %s1779_s26, 4  ;;  %s1545_s14 = int_to_ptr.vmem [resolvable:$false] %s1544_s14 }
  0x93   : > { %s1546_s17 = scalar_lea.vmem %s1545_s14, 1024  ;;  %p1547_p13 = scmp.lt.s32.totalorder %s2048_s22, %s1545_s14 }
  0x94   : > { %p1542_p11 = pnand %p1540_p0, %p1943_p4  ;;  %p1548_p2 = scmp.lt.s32.totalorder %s1546_s17, %s1539_s3 }
  0x96   : > { %p1543_p3 = pneg %p1542_p11  ;;  %p1549_p10 = por %p1548_p2, %p1547_p13 }
  0x98   : > { %p1550_p8 = pnand %p1549_p10, %p1543_p3 }
  0x9a   : > { %1553 = shalt.err (!%p1550_p8)
}
  0x9b   : > { %s2571_s1 = smov 8   ;;  %s2572_s30 = smov 128  }
  0x9c   : > { %1320 = dma.hbm_to_vmem [thread:$0]  (!%p2566_p5), %s2044_s24, 512, %s2048_s22, %s346_s23, %s2572_s30, %s2572_s30, %s2571_s1  }
  0x9d   : > { %s393_s20 = scalar_lea.vmem [#allocation13], %s1980_s27  ;;  %s2088_s26 = scalar_lea.hbm %s2510_s4, %s1983_s18 }
  0x9e   : > { %s401_s9 = sshll.u32 %s393_s20, 4  ;;  %s1554_s14 = scalar_lea.hbm %s2054_s6, 128  ;;  %s402_s9 = int_to_ptr.vmem [resolvable:$true] %s401_s9 }
  0x9f   : > { %p1555_p7 = scmp.ne.s32.totalorder %s2054_s6, %s1554_s14  ;;  %s1559_s13 = scalar_lea.hbm %s2508_s2, 256 }
  0xa0   : > { %p1560_p1 = scmp.lt.u32.totalorder %s2054_s6, %s2508_s2  ;;  %p1561_p6 = scmp.lt.u32.totalorder %s1559_s13, %s1554_s14 }
  0xa1   : > { %p1557_p9 = pnand %p1555_p7, %p1943_p4  ;;  %p1563_p11 = scmp.lt.u32.totalorder %s1554_s14, %s2054_s6 }
  0xa2   : > { %p1562_p0 = por %p1561_p6, %p1560_p1 }
  0xa3   : > { %p1558_p12 = pneg %p1557_p9 }
  0xa4   : > { %p1564_p3 = por %p1563_p11, %p1562_p0 }
  0xa6   : > { %p1565_p13 = pnand %p1564_p3, %p1558_p12 }
  0xa8   : > { %1568 = shalt.err (!%p1565_p13)
}
  0xa9   : > { %s1569_s24 = scalar_lea.vmem %s402_s9, 128  ;;  %s1780_s22 = smov [#allocation13]  }
  0xaa   : > { %p1570_p2 = scmp.ne.s32.totalorder %s402_s9, %s1569_s24  ;;  %s1574_s23 = sshll.u32 %s1780_s22, 4  ;;  %s1575_s23 = int_to_ptr.vmem [resolvable:$false] %s1574_s23 }
  0xab   : > { %s1576_s0 = scalar_lea.vmem %s1575_s23, 256  ;;  %p1577_p7 = scmp.lt.s32.totalorder %s402_s9, %s1575_s23 }
  0xac   : > { %p1572_p10 = pnand %p1570_p2, %p1943_p4  ;;  %p1578_p9 = scmp.lt.s32.totalorder %s1576_s0, %s1569_s24 }
  0xae   : > { %p1573_p8 = pneg %p1572_p10  ;;  %p1579_p5 = por %p1578_p9, %p1577_p7 }
  0xb0   : > { %p1580_p1 = pnand %p1579_p5, %p1573_p8 }
  0xb2   : > { %1583 = shalt.err (!%p1580_p1)
}
  0xb3   : > { %p2573_p6 = scmp.ne.s32.totalorder %s2555_s28, 0  ;;  %s2574_s5 = scalar_lea.sflag [#allocation12], %s1923_s29 }
  0xb4   : > { %s431_s12 = scalar_lea.vmem [#allocation16], %s1980_s27  ;;  %s2114_s20 = scalar_lea.hbm %s2513_s7, %s1983_s18 }
  0xb5   : > { %1326 = dma.hbm_to_vmem [thread:$0]  (!%p2573_p6), %s2054_s6, 128, %s402_s9, %s2574_s5  }
  0xb6   : > { %s439_s13 = sshll.u32 %s431_s12, 4  ;;  %s1584_s11 = scalar_lea.hbm %s2088_s26, 128  ;;  %s440_s13 = int_to_ptr.vmem [resolvable:$true] %s439_s13 }
  0xb7   : > { %p1585_p5 = scmp.ne.s32.totalorder %s2088_s26, %s1584_s11  ;;  %s1589_s17 = scalar_lea.hbm %s2510_s4, 256 }
  0xb8   : > { %p1590_p11 = scmp.lt.u32.totalorder %s2088_s26, %s2510_s4  ;;  %p1591_p3 = scmp.lt.u32.totalorder %s1589_s17, %s1584_s11 }
  0xb9   : > { %p1587_p12 = pnand %p1585_p5, %p1943_p4  ;;  %p1593_p2 = scmp.lt.u32.totalorder %s1584_s11, %s2088_s26 }
  0xba   : > { %p1592_p13 = por %p1591_p3, %p1590_p11 }
  0xbb   : > { %p1588_p0 = pneg %p1587_p12 }
  0xbc   : > { %p1594_p10 = por %p1593_p2, %p1592_p13 }
  0xbe   : > { %p1595_p8 = pnand %p1594_p10, %p1588_p0 }
  0xc0   : > { %1598 = shalt.err (!%p1595_p8)
}
  0xc1   : > { %s1599_s6 = scalar_lea.vmem %s440_s13, 128  ;;  %s1781_s9 = smov [#allocation16]  }
  0xc2   : > { %p1600_p7 = scmp.ne.s32.totalorder %s440_s13, %s1599_s6  ;;  %s1604_s23 = sshll.u32 %s1781_s9, 4  ;;  %s1605_s23 = int_to_ptr.vmem [resolvable:$false] %s1604_s23 }
  0xc3   : > { %s1606_s0 = scalar_lea.vmem %s1605_s23, 256  ;;  %p1607_p5 = scmp.lt.s32.totalorder %s440_s13, %s1605_s23 }
  0xc4   : > { %p1602_p9 = pnand %p1600_p7, %p1943_p4  ;;  %p1608_p12 = scmp.lt.s32.totalorder %s1606_s0, %s1599_s6 }
  0xc6   : > { %p1603_p1 = pneg %p1602_p9  ;;  %p1609_p6 = por %p1608_p12, %p1607_p5 }
  0xc8   : > { %p1610_p3 = pnand %p1609_p6, %p1603_p1 }
  0xca   : > { %1613 = shalt.err (!%p1610_p3)
}
  0xcb   : > { %p2575_p11 = scmp.ne.s32.totalorder %s2555_s28, 0  ;;  %s2576_s5 = scalar_lea.sflag [#allocation15], %s1923_s29 }
  0xcc   : > { %s478_s12 = scalar_lea.vmem [#allocation19], %s1980_s27  ;;  %s1614_s30 = scalar_lea.hbm %s2114_s20, 128 }
  0xcd   : > { %1332 = dma.hbm_to_vmem [thread:$0]  (!%p2575_p11), %s2088_s26, 128, %s440_s13, %s2576_s5  }
  0xce   : > { %s486_s1 = sshll.u32 %s478_s12, 4  ;;  %p1615_p0 = scmp.ne.s32.totalorder %s2114_s20, %s1614_s30  ;;  %s487_s1 = int_to_ptr.vmem [resolvable:$true] %s486_s1 }
  0xcf   : > { %s1619_s14 = scalar_lea.hbm %s2513_s7, 256  ;;  %p1620_p2 = scmp.lt.u32.totalorder %s2114_s20, %s2513_s7 }
  0xd0   : > { %p1617_p6 = pnand %p1615_p0, %p1943_p4  ;;  %p1621_p10 = scmp.lt.u32.totalorder %s1619_s14, %s1614_s30 }
  0xd1   : > { %p1623_p7 = scmp.lt.u32.totalorder %s1614_s30, %s2114_s20 }
  0xd2   : > { %p1618_p13 = pneg %p1617_p6  ;;  %p1622_p8 = por %p1621_p10, %p1620_p2 }
  0xd4   : > { %p1624_p9 = por %p1623_p7, %p1622_p8 }
  0xd6   : > { %p1625_p1 = pnand %p1624_p9, %p1618_p13 }
  0xd8   : > { %1628 = shalt.err (!%p1625_p1)
}
  0xd9   : > { %s1629_s26 = scalar_lea.vmem %s487_s1, 128  ;;  %s1782_s13 = smov [#allocation19]  }
  0xda   : > { %p1630_p5 = scmp.ne.s32.totalorder %s487_s1, %s1629_s26  ;;  %s1634_s22 = sshll.u32 %s1782_s13, 4  ;;  %s1635_s22 = int_to_ptr.vmem [resolvable:$false] %s1634_s22 }
  0xdb   : > { %s1636_s6 = scalar_lea.vmem %s1635_s22, 256  ;;  %p1637_p0 = scmp.lt.s32.totalorder %s487_s1, %s1635_s22 }
  0xdc   : > { %p1632_p12 = pnand %p1630_p5, %p1943_p4  ;;  %p1638_p6 = scmp.lt.s32.totalorder %s1636_s6, %s1629_s26 }
  0xde   : > { %p1633_p3 = pneg %p1632_p12  ;;  %p1639_p11 = por %p1638_p6, %p1637_p0 }
  0xe0   : > { %p1640_p2 = pnand %p1639_p11, %p1633_p3 }
  0xe2   : > { %1643 = shalt.err (!%p1640_p2)
}
  0xe3   : > { %p2577_p10 = scmp.ne.s32.totalorder %s2555_s28, 0  ;;  %s2578_s9 = scalar_lea.sflag [#allocation18], %s1923_s29 }
  0xe4   : > { %s2159_s5 = scalar_lea.hbm %s2514_s8, %s1983_s18  ;;  %s497_s12 = scalar_lea.vmem [#allocation20], %s1980_s27 }
  0xe5   : > { %1338 = dma.hbm_to_vmem [thread:$0]  (!%p2577_p10), %s2114_s20, 128, %s487_s1, %s2578_s9  }
  0xe6   : > { %s505_s30 = sshll.u32 %s497_s12, 4  ;;  %s494_s11 = scalar_lea.sflag [#allocation21], %s1912_s25  ;;  %s506_s30 = int_to_ptr.vmem [resolvable:$true] %s505_s30 }
  0xe7   : > { %s1644_s29 = scalar_lea.hbm %s2159_s5, 128  ;;  %s1649_s1 = scalar_lea.hbm %s2514_s8, 256 }
  0xe8   : > { %p1645_p11 = scmp.ne.s32.totalorder %s2159_s5, %s1644_s29  ;;  %p1650_p7 = scmp.lt.u32.totalorder %s2159_s5, %s2514_s8 }
  0xe9   : > { %p1651_p9 = scmp.lt.u32.totalorder %s1649_s1, %s1644_s29  ;;  %p1653_p5 = scmp.lt.u32.totalorder %s1644_s29, %s2159_s5 }
  0xea   : > { %p1647_p13 = pnand %p1645_p11, %p1943_p4 }
  0xeb   : > { %p1652_p1 = por %p1651_p9, %p1650_p7 }
  0xec   : > { %p1648_p8 = pneg %p1647_p13 }
  0xed   : > { %p1654_p12 = por %p1653_p5, %p1652_p1 }
  0xef   : > { %p1655_p3 = pnand %p1654_p12, %p1648_p8 }
  0xf1   : > { %1658 = shalt.err (!%p1655_p3)
}
  0xf2   : > { %s1659_s25 = scalar_lea.vmem %s506_s30, 128  ;;  %s1783_s27 = smov [#allocation20]  }
  0xf3   : > { %p1660_p0 = scmp.ne.s32.totalorder %s506_s30, %s1659_s25  ;;  %s1664_s17 = sshll.u32 %s1783_s27, 4  ;;  %s1665_s17 = int_to_ptr.vmem [resolvable:$false] %s1664_s17 }
  0xf4   : > { %s1666_s24 = scalar_lea.vmem %s1665_s17, 256  ;;  %p1667_p11 = scmp.lt.s32.totalorder %s506_s30, %s1665_s17 }
  0xf5   : > { %p1662_p6 = pnand %p1660_p0, %p1943_p4  ;;  %p1668_p13 = scmp.lt.s32.totalorder %s1666_s24, %s1659_s25 }
  0xf7   : > { %p1663_p2 = pneg %p1662_p6  ;;  %p1669_p10 = por %p1668_p13, %p1667_p11 }
  0xf9   : > { %p1670_p7 = pnand %p1669_p10, %p1663_p2 }
  0xfb   : > { %1673 = shalt.err (!%p1670_p7)
}
  0xfc   : > { %p2579_p9 = scmp.ne.s32.totalorder %s2555_s28, 0  ;;  %p2580_p8 = scmp.ne.s32.totalorder %s2561_s19, 0 }
  0xfd   : > { %s2183_s16 = sand.u32 (!%p2580_p8), 1, %s1756_s10   ;;  %p2581_p4 = scmp.ne.s32.totalorder (!%p2580_p8), %s2549_s21, 0 }
  0xfe   : > { %1341 = dma.hbm_to_vmem [thread:$0]  (!%p2579_p9), %s2159_s5, 128, %s506_s30, %s494_s11  }
  0xff   : > { %514 = sbr.rel (%p2580_p8) target bundleno = 848 (0x350), region = 56  ;;  %s1275_s26 = sshll.u32 (!%p2580_p8), %s2183_s16, 5 }
 0x100   : > { %s517_s13 = scalar_lea.sflag (!%p2580_p8), [#allocation9], %s2183_s16  ;;  %s2187_s22 = scalar_lea.vmem (!%p2580_p8), [#allocation8], %s1275_s26 }
 0x106   : > { %1727 = dma.done.wait (%p2581_p4), %s517_s13, 512  }
 0x107   : > { %1729 = vsyncadd (%p2581_p4), %s517_s13, 4294966784  ;;  %s525_s28 = sand.u32 1, %s1874_s15   ;;  %s2194_s6 = scalar_lea.vmem [#allocation11], %s1275_s26 }
 0x108   : > { %s526_s19 = scalar_lea.sflag [#allocation12], %s525_s28 }
 0x109   : > { %1731 = dma.done.wait (%p2581_p4), %s526_s19, 640  }
 0x10a   : > { %1733 = vsyncadd (%p2581_p4), %s526_s19, 4294966656  ;;  %s2201_s9 = sshll.u32 %s2183_s16, 3  ;;  %s544_s0 = scalar_lea.sflag [#allocation15], %s525_s28 }
 0x10b   : > { %s538_s23 = scalar_lea.vmem [#allocation13], %s2201_s9  ;;  %s547_s5 = scalar_lea.vmem [#allocation14], %s2201_s9 }
 0x10c   : > { %1735 = dma.done.wait (%p2581_p4), %s544_s0, 256  }
 0x10d   : > { %1737 = vsyncadd (%p2581_p4), %s544_s0, 4294967040  ;;  %s556_s15 = scalar_lea.vmem [#allocation16], %s2201_s9  ;;  %s562_s12 = scalar_lea.sflag [#allocation18], %s525_s28 }
 0x10e   : > { %s565_s30 = scalar_lea.vmem [#allocation17], %s2201_s9 }
 0x10f   : > { %1739 = dma.done.wait (%p2581_p4), %s562_s12, 256  }
 0x110   : > { %1741 = vsyncadd (%p2581_p4), %s562_s12, 4294967040  ;;  %s574_s11 = scalar_lea.vmem [#allocation19], %s2201_s9  ;;  %s580_s29 = scalar_lea.sflag [#allocation21], %s2183_s16 }
 0x111   : > { %s583_s3 = scalar_lea.vmem [#allocation20], %s2201_s9 }
 0x112   : > { %1743 = dma.done.wait (%p2581_p4), %s580_s29, 128  }
 0x113   : > { %1745 = vsyncadd (%p2581_p4), %s580_s29, 4294967168  ;;  %v701_v0 = vlaneseq  ;;  %v2231_v3 = vld [vmem:[%s2187_s22 + $0x10] sm:$0xff]  ;;  %v2238_v5 = vld [vmem:[%s2187_s22] sm:$0xff]  ;;  %s1784_s21 = smov 1   ;;  %s1785_s20 = smov 127  }
 0x114   : > { %v2247_v8 = vld [vmem:[%s2187_s22 + $0x8] sm:$0xff]  ;;  %v2255_v10 = vld [vmem:[%s2187_s22 + $0x18] sm:$0xff]  ;;  %s1786_s1 = smov 3   ;;  %s1787_s14 = smov 125  }
 0x115   : > { %v2223_v1 = vand.u32 127, %v701_v0  ;;  %s2584_s18 = sld [smem:[#allocation31_spill]]  ;;  %s1297_s25 = smul.u32 48, %s2183_s16 }
 0x116   : > { %s2585_s28 = sld [smem:[#allocation41_spill]]  ;;  %s2586_s9 = sld [smem:[#allocation35_spill]] }
 0x117   : > { %v2226_v2 = vand.u32 15, %v2223_v1  ;;  %s2380_s26 = scalar_lea.vmem [#allocation22], %s1297_s25  ;;  %s1790_s29 = smov [#allocation22]  }
 0x119   : > { %vm715_vm0 = vcmp.ge.s32.totalorder %v2226_v2, 4  ;;  %vm716_vm1 = vcmp.lt.s32.totalorder %v2226_v2, 8  ;;  %vm719_vm3 = vcmp.lt.s32.totalorder %v2226_v2, 9  ;;  %vm718_vm4 = vcmp.lt.s32.totalorder %v2226_v2, 4 }
 0x11a   : > { %vm2233_vm2 = vmand %vm715_vm0, %vm716_vm1 }
 0x11b   : > { %v739_v6 = vsel %vm2233_vm2, %v2231_v3, -1e+30  ;;  %v737_v7 = vsel %vm2233_vm2, %v2238_v5, -1e+30  ;;  %v738_v9 = vsel %vm2233_vm2, %v2247_v8, -1e+30 }
 0x11c   : > { %745 = vrot.lane.b32.xlu1 %v739_v6, %s1784_s21  ;;  %741 = vrot.lane.b32.xlu0 %v737_v7, %s1784_s21  ;;  %v740_v11 = vsel %vm2233_vm2, %v2255_v10, -1e+30  ;;  %p666_p10 = scmp.lt.s32.totalorder %s2584_s18, 1  ;;  %s1290_s17 = sshll.u32 %s2584_s18, 10 }
 0x11d   : > { %p2588_p5 = scmp.ne.s32.totalorder %s2586_s9, 0 }
 0x11e   : > { %s667_s27 = scalar_select %p666_p10, %s2584_s18, 1 }
 0x120   : > { %753 = vrot.lane.b32.xlu1 %v737_v7, %s1785_s20  ;;  %743 = vrot.lane.b32.xlu0 %v738_v9, %s1784_s21  ;;  %s1283_s24 = sshll.u32 %s667_s27, 3 }
 0x121   : > { %s669_s19 = scalar_lea.vmem %s2585_s28, %s1283_s24 }
 0x124   : > { %755 = vrot.lane.b32.xlu0 %v738_v9, %s1785_s20  ;;  %747 = vrot.lane.b32.xlu1 %v740_v11, %s1784_s21 }
 0x128   : > { %757 = vrot.lane.b32.xlu0 %v739_v6, %s1785_s20  ;;  %759 = vrot.lane.b32.xlu1 %v740_v11, %s1785_s20 }
 0x18e   : > { %v746_v12 = vpop.permute.xlu1 %745  ;;  %v742_v13 = vpop.permute.xlu0 %741 }
 0x18f   : > { %v749_v14 = vmax.f32 %v737_v7, %v742_v13  ;;  %v751_v22 = vmax.f32 %v739_v6, %v746_v12 }
 0x192   : > { %v754_v15 = vpop.permute.xlu1 %753  ;;  %v744_v16 = vpop.permute.xlu0 %743 }
 0x193   : > { %v761_v17 = vmax.f32 %v749_v14, %v754_v15  ;;  %v750_v18 = vmax.f32 %v738_v9, %v744_v16  ;;  %v2329_v9 = vld [vmem:[%s547_s5] sm:$0xff] }
 0x194   : > { %v941_v12 = vand.u32 2147483647, %v2329_v9 }
 0x195   : > { %765 = vrot.lane.b32.xlu0 %v761_v17, %s1786_s1 }
 0x196   : > { %v756_v19 = vpop.permute.xlu0 %755  ;;  %v748_v20 = vpop.permute.xlu1 %747  ;;  %v942_v16 = vsub.f32 0.0, %v941_v12 }
 0x197   : > { %v762_v21 = vmax.f32 %v750_v18, %v756_v19  ;;  %v752_v23 = vmax.f32 %v740_v11, %v748_v20 }
 0x198   : > { %v943_v18 = vmul.f32 1.442695, %v942_v16 }
 0x199   : > { %767 = vrot.lane.b32.xlu1 %v762_v21, %s1786_s1 }
 0x19a   : > { %v758_v24 = vpop.permute.xlu0 %757  ;;  %v760_v25 = vpop.permute.xlu1 %759 }
 0x19b   : > { %v763_v26 = vmax.f32 %v751_v22, %v758_v24  ;;  %v764_v27 = vmax.f32 %v752_v23, %v760_v25  ;;  %v692_v22 = vld [vmem:[%s538_s23] sm:$0xff]  ;;  %s999_s23 = sshll.u32 %s2380_s26, 4  ;;  %s2455_s23 = int_to_ptr.vmem [resolvable:$true] %s999_s23 }
 0x19c   : > { %v693_v25 = vunpack.c.0.s8 %v692_v22  ;;  %v695_v2 = vunpack.c.2.s8 %v692_v22 }
 0x19d   : > { %777 = vrot.lane.b32.xlu1 %v761_v17, %s1787_s14  ;;  %769 = vrot.lane.b32.xlu0 %v763_v26, %s1786_s1 }
 0x1a1   : > { %771 = vrot.lane.b32.xlu1 %v764_v27, %s1786_s1  ;;  %779 = vrot.lane.b32.xlu0 %v762_v21, %s1787_s14 }
 0x1a5   : > { %783 = vrot.lane.b32.xlu1 %v764_v27, %s1787_s14  ;;  %781 = vrot.lane.b32.xlu0 %v763_v26, %s1787_s14 }
 0x207   : > { %v766_v28 = vpop.permute.xlu0 %765 }
 0x208   : > { %v773_v30 = vmax.f32 %v761_v17, %v766_v28  ;;  %v697_v28 = vcvt.s32.f32 %v693_v25 }
 0x20b   : > { %v768_v29 = vpop.permute.xlu1 %767 }
 0x20c   : > { %v774_v34 = vmax.f32 %v762_v21, %v768_v29 }
 0x20f   : > { %v778_v31 = vpop.permute.xlu1 %777  ;;  %v770_v32 = vpop.permute.xlu0 %769 }
 0x210   : > { %v785_v33 = vmax.f32 %v773_v30, %v778_v31  ;;  %v775_v41 = vmax.f32 %v763_v26, %v770_v32  ;;  %v1788_v26 = vmov 2.0   ;;  %v694_v30 = vunpack.c.1.s8 %v692_v22 }
 0x212   : > { %v2275_v35 = vsub.f32 %v2238_v5, %v785_v33  ;;  %v698_v32 = vcvt.s32.f32 %v694_v30 }
 0x213   : > { %v772_v36 = vpop.permute.xlu1 %771  ;;  %v780_v37 = vpop.permute.xlu0 %779 }
 0x214   : > { %v793_v38 = vsel %vm2233_vm2, %v2275_v35, -1e+30  ;;  %v786_v39 = vmax.f32 %v774_v34, %v780_v37  ;;  %v776_v42 = vmax.f32 %v764_v27, %v772_v36  ;;  %v1296_v27 = vsel %vm719_vm3, 1.0, %v1788_v26 }
 0x215   : > { %v797_v40 = vmul.f32 1.442695, %v793_v38  ;;  %v1285_v29 = vsel %vm718_vm4, 0.0, %v1296_v27  ;;  %v696_v34 = vunpack.c.3.s8 %v692_v22  ;;  %v1789_v36 = vmov 0.0  }
 0x216   : > { %v2281_v43 = vsub.f32 %v2247_v8, %v786_v39  ;;  %vm723_vm5 = vcmp.eq.f32.partialorder %v697_v28, %v1285_v29  ;;  %vm724_vm6 = vcmp.eq.f32.partialorder %v698_v32, %v1285_v29 }
 0x217   : > { %1406 = vpow2.f32 %v797_v40  ;;  %v784_v44 = vpop.permute.xlu1 %783  ;;  %v782_v45 = vpop.permute.xlu0 %781  ;;  %v2359_v37 = vsel %vm723_vm5, 1.0, %v1789_v36  ;;  %v2361_v38 = vsel %vm724_vm6, 1.0, %v1789_v36  ;;  %v700_v39 = vcvt.s32.f32 %v696_v34 }
 0x218   : > { %v794_v46 = vsel %vm2233_vm2, %v2281_v43, -1e+30  ;;  %v788_v47 = vmax.f32 %v776_v42, %v784_v44  ;;  %v787_v48 = vmax.f32 %v775_v41, %v782_v45  ;;  %v699_v40 = vcvt.s32.f32 %v695_v2 }
 0x219   : > { %v799_v49 = vmul.f32 1.442695, %v794_v46  ;;  %v904_v41 = vadd.f32 %v2361_v38, %v2359_v37  ;;  %vm726_vm8 = vcmp.eq.f32.partialorder %v700_v39, %v1285_v29  ;;  %v931_v44 = vshrl.u32 %v701_v0, 7 }
 0x21a   : > { %v2287_v50 = vsub.f32 %v2255_v10, %v788_v47  ;;  %v2290_v51 = vsub.f32 %v2231_v3, %v787_v48  ;;  %vm725_vm7 = vcmp.eq.f32.partialorder %v699_v40, %v1285_v29  ;;  %v2371_v46 = vsel %vm726_vm8, 1.0, %v1789_v36  ;;  %v929_v47 = vld [vmem:[%s556_s15] sm:$0xff]  ;;  %s2587_s15 = sld [smem:[#allocation43_spill]] }
 0x21b   : > { %1408 = vpow2.f32 %v799_v49  ;;  %v2366_v42 = vsel %vm725_vm7, 1.0, %v1789_v36  ;;  %v933_v48 = vmul.u32 128, %v931_v44 }
 0x21c   : > { %v796_v52 = vsel %vm2233_vm2, %v2287_v50, -1e+30  ;;  %v795_v53 = vsel %vm2233_vm2, %v2290_v51, -1e+30  ;;  %v905_v45 = vadd.f32 %v2366_v42, %v904_v41 }
 0x21d   : > { %v801_v54 = vmul.f32 1.442695, %v795_v53  ;;  %v803_v55 = vmul.f32 1.442695, %v796_v52  ;;  %v938_v52 = vmax.f32 %v2329_v9, 0.0  ;;  %v939_v53 = vmul.f32 %v929_v47, %v2329_v9  ;;  %v954_v9 = vld [vmem:[%s669_s19] sm:$0xff] }
 0x21e   : > { %v906_v49 = vadd.f32 %v2371_v46, %v905_v45 }
 0x21f   : > { %1410 = vpow2.f32 %v801_v54  ;;  %v934_v54 = vstv %s1290_s17 }
 0x220   : > { %1412 = vpow2.f32 %v803_v55  ;;  %976 = vst [vmem:[%s2380_s26 + $0x8] sm:$0xff] %v906_v49  ;;  %v935_v55 = vadd.s32 %v934_v54, %v933_v48  ;;  %v688_v49 = vld [vmem:[%s2194_s6] sm:$0xff] }
 0x221   : > { %v2298_v56 = vpop.eup %1406  ;;  %1414 = vpow2.f32 %v943_v18 }
 0x222   : > { %805 = vrot.lane.b32.xlu0 %v2298_v56, %s1784_s21  ;;  %v936_v12 = vadd.s32 %v935_v55, %v2223_v1 }
 0x224   : > { %vm937_vm9 = vcmp.lt.s32.totalorder %v936_v12, 10 }
 0x225   : > { %v2302_v57 = vpop.eup %1408 }
 0x226   : > { %807 = vrot.lane.b32.xlu1 %v2302_v57, %s1784_s21 }
 0x229   : > { %v2306_v58 = vpop.eup %1410 }
 0x22a   : > { %817 = vrot.lane.b32.xlu1 %v2298_v56, %s1785_s20  ;;  %809 = vrot.lane.b32.xlu0 %v2306_v58, %s1784_s21  ;;  %v2312_v59 = vpop.eup %1412 }
 0x22b   : > { %v1415_v31 = vpop.eup %1414 }
 0x22c   : > { %v945_v33 = vadd.f32 1.0, %v1415_v31 }
 0x22e   : > { %811 = vrot.lane.b32.xlu1 %v2312_v59, %s1784_s21  ;;  %819 = vrot.lane.b32.xlu0 %v2302_v57, %s1785_s20  ;;  %1416 = vlog2.f32 %v945_v33 }
 0x232   : > { %823 = vrot.lane.b32.xlu1 %v2312_v59, %s1785_s20  ;;  %821 = vrot.lane.b32.xlu0 %v2306_v58, %s1785_s20 }
 0x238   : > { %v1417_v0 = vpop.eup %1416 }
 0x294   : > { %v806_v60 = vpop.permute.xlu0 %805 }
 0x295   : > { %v813_v62 = vadd.f32 %v2298_v56, %v806_v60  ;;  %v940_v60 = vsub.f32 %v938_v52, %v939_v53  ;;  %v689_v53 = vld [vmem:[%s2194_s6 + $0x8] sm:$0xff] }
 0x298   : > { %v808_v61 = vpop.permute.xlu1 %807 }
 0x299   : > { %v814_v11 = vadd.f32 %v2302_v57, %v808_v61  ;;  %v947_v61 = vmul.f32 0.6931472, %v1417_v0 }
 0x29c   : > { %v818_v63 = vpop.permute.xlu1 %817  ;;  %v810_v7 = vpop.permute.xlu0 %809 }
 0x29d   : > { %v2323_v6 = vadd.f32 %v818_v63, %v813_v62  ;;  %v815_v17 = vadd.f32 %v2306_v58, %v810_v7  ;;  %v955_v62 = vld [vmem:[%s565_s30] sm:$0xff]  ;;  %v962_v63 = vld [vmem:[%s574_s11] sm:$0xff]  ;;  %s986_s30 = scalar_lea.sflag [#allocation10], %s2183_s16  ;;  %s1674_s11 = scalar_lea.vmem %s2455_s23, 768 }
 0x29e   : > { %v963_v7 = vld [vmem:[%s583_s3] sm:$0xff]  ;;  %p1675_p1 = scmp.ne.s32.totalorder %s2455_s23, %s1674_s11  ;;  %s1678_s3 = sshll.u32 %s1790_s29, 4  ;;  %s1679_s3 = int_to_ptr.vmem [resolvable:$false] %s1678_s3 }
 0x29f   : > { %829 = vrot.lane.b32.xlu0 %v2323_v6, %s1786_s1  ;;  %s1680_s21 = scalar_lea.vmem %s1679_s3, 1536  ;;  %p1681_p0 = scmp.lt.s32.totalorder %s2455_s23, %s1679_s3 }
 0x2a0   : > { %v812_v13 = vpop.permute.xlu1 %811  ;;  %v820_v14 = vpop.permute.xlu0 %819  ;;  %p1676_p12 = pnand %p1675_p1, %p2588_p5  ;;  %p1682_p6 = scmp.lt.s32.totalorder %s1680_s21, %s1674_s11 }
 0x2a1   : > { %v2333_v15 = vadd.f32 %v820_v14, %v814_v11  ;;  %v816_v23 = vadd.f32 %v2312_v59, %v812_v13  ;;  %v964_v11 = vsub.f32 %v962_v63, %v963_v7  ;;  %v948_v13 = vadd.f32 %v947_v61, %v940_v60 }
 0x2a2   : > { %v956_v14 = vsub.f32 %v954_v9, %v955_v62  ;;  %p1677_p3 = pneg %p1676_p12  ;;  %p1683_p2 = por %p1682_p6, %p1681_p0 }
 0x2a3   : > { %831 = vrot.lane.b32.xlu1 %v2333_v15, %s1786_s1  ;;  %v966_v16 = vmul.f32 %v964_v11, %v964_v11  ;;  %v950_v18 = vsel %vm937_vm9, %v948_v13, 0.0  ;;  %v691_v11 = vld [vmem:[%s2194_s6 + $0x18] sm:$0xff] }
 0x2a4   : > { %v822_v19 = vpop.permute.xlu0 %821  ;;  %v824_v21 = vpop.permute.xlu1 %823  ;;  %980 = vst [vmem:[%s2380_s26 + $0x18] sm:$0xff] %v950_v18  ;;  %v690_v18 = vld [vmem:[%s2194_s6 + $0x10] sm:$0xff]  ;;  %s1298_s6 = smul.u32 768, %s2584_s18  ;;  %p1684_p11 = pnand %p1683_p2, %p1677_p3 }
 0x2a5   : > { %v2338_v20 = vadd.f32 %v822_v19, %v815_v17  ;;  %v2348_v24 = vadd.f32 %v824_v21, %v816_v23  ;;  %v958_v17 = vmul.f32 %v956_v14, %v956_v14  ;;  %984 = vst [vmem:[%s2380_s26 + $0x28] sm:$0xff] %v966_v16 }
 0x2a6   : > { %s2453_s12 = scalar_lea.hbm %s2587_s15, %s1298_s6 }
 0x2a7   : > { %841 = vrot.lane.b32.xlu1 %v2323_v6, %s1787_s14  ;;  %833 = vrot.lane.b32.xlu0 %v2338_v20, %s1786_s1  ;;  %982 = vst [vmem:[%s2380_s26 + $0x20] sm:$0xff] %v958_v17 }
 0x2ab   : > { %835 = vrot.lane.b32.xlu1 %v2348_v24, %s1786_s1  ;;  %843 = vrot.lane.b32.xlu0 %v2333_v15, %s1787_s14 }
 0x2af   : > { %847 = vrot.lane.b32.xlu1 %v2348_v24, %s1787_s14  ;;  %845 = vrot.lane.b32.xlu0 %v2338_v20, %s1787_s14 }
 0x311   : > { %v830_v19 = vpop.permute.xlu0 %829 }
 0x312   : > { %v837_v22 = vadd.f32 %v830_v19, %v2323_v6 }
 0x315   : > { %v832_v21 = vpop.permute.xlu1 %831 }
 0x316   : > { %v838_v27 = vadd.f32 %v832_v21, %v2333_v15 }
 0x319   : > { %v842_v23 = vpop.permute.xlu1 %841  ;;  %v834_v25 = vpop.permute.xlu0 %833 }
 0x31a   : > { %v849_v26 = vadd.f32 %v842_v23, %v837_v22  ;;  %v839_v31 = vadd.f32 %v834_v25, %v2338_v20 }
 0x31c   : > { %v853_v1 = vsel %vm2233_vm2, %v849_v26, 1.0 }
 0x31d   : > { %1418 = vlog2.f32 %v853_v1  ;;  %v836_v28 = vpop.permute.xlu1 %835  ;;  %v844_v29 = vpop.permute.xlu0 %843 }
 0x31e   : > { %1420 = vrcp.f32 %v853_v1  ;;  %v850_v30 = vadd.f32 %v844_v29, %v838_v27  ;;  %v840_v32 = vadd.f32 %v836_v28, %v2348_v24 }
 0x320   : > { %v854_v6 = vsel %vm2233_vm2, %v850_v30, 1.0 }
 0x321   : > { %1422 = vlog2.f32 %v854_v6  ;;  %v848_v33 = vpop.permute.xlu1 %847  ;;  %v846_v34 = vpop.permute.xlu0 %845 }
 0x322   : > { %1424 = vrcp.f32 %v854_v6  ;;  %v852_v15 = vadd.f32 %v848_v33, %v840_v32  ;;  %v851_v2 = vadd.f32 %v846_v34, %v839_v31 }
 0x324   : > { %v856_v36 = vsel %vm2233_vm2, %v852_v15, 1.0  ;;  %v855_v39 = vsel %vm2233_vm2, %v851_v2, 1.0 }
 0x325   : > { %1426 = vlog2.f32 %v856_v36 }
 0x326   : > { %1428 = vrcp.f32 %v856_v36 }
 0x327   : > { %v1419_v20 = vpop.eup %1418  ;;  %1430 = vlog2.f32 %v855_v39 }
 0x328   : > { %v1421_v24 = vpop.eup %1420  ;;  %v858_v40 = vmul.f32 0.6931472, %v1419_v20  ;;  %1432 = vrcp.f32 %v855_v39 }
 0x329   : > { %v874_v41 = vmul.f32 %v1421_v24, %v2298_v56 }
 0x32a   : > { %v865_v44 = vsub.f32 %v2275_v35, %v858_v40 }
 0x32b   : > { %v1423_v45 = vpop.eup %1422  ;;  %v881_v52 = vsel %vm2233_vm2, %v874_v41, %v2238_v5 }
 0x32c   : > { %v1425_v47 = vpop.eup %1424  ;;  %v860_v48 = vmul.f32 0.6931472, %v1423_v45  ;;  %v869_v54 = vsel %vm2233_vm2, %v865_v44, 0.0  ;;  %v885_v61 = vsub.f32 %v688_v49, %v881_v52 }
 0x32d   : > { %v876_v0 = vmul.f32 %v1425_v47, %v2302_v57  ;;  %v910_v57 = vmul.f32 %v869_v54, %v688_v49 }
 0x32e   : > { %v866_v55 = vsub.f32 %v2281_v43, %v860_v48  ;;  %v889_v21 = vmul.f32 %v885_v61, %v885_v61 }
 0x32f   : > { %v1427_v56 = vpop.eup %1426  ;;  %v882_v35 = vsel %vm2233_vm2, %v876_v0, %v2247_v8  ;;  %v914_v25 = vsub.f32 0.0, %v910_v57 }
 0x330   : > { %v1429_v60 = vpop.eup %1428  ;;  %v870_v62 = vsel %vm2233_vm2, %v866_v55, 0.0  ;;  %v886_v5 = vsub.f32 %v689_v53, %v882_v35  ;;  %v864_v63 = vmul.f32 0.6931472, %v1427_v56  ;;  %v894_v29 = vmul.f32 %v2359_v37, %v889_v21 }
 0x331   : > { %v1431_v7 = vpop.eup %1430  ;;  %v911_v9 = vmul.f32 %v870_v62, %v689_v53  ;;  %v880_v12 = vmul.f32 %v1429_v60, %v2312_v59  ;;  %v918_v31 = vmul.f32 %v2359_v37, %v914_v25 }
 0x332   : > { %v1433_v43 = vpop.eup %1432  ;;  %v890_v13 = vmul.f32 %v886_v5, %v886_v5  ;;  %v868_v14 = vsub.f32 %v2287_v50, %v864_v63  ;;  %v862_v16 = vmul.f32 0.6931472, %v1431_v7 }
 0x333   : > { %v915_v8 = vsub.f32 0.0, %v911_v9  ;;  %v884_v17 = vsel %vm2233_vm2, %v880_v12, %v2255_v10  ;;  %v878_v19 = vmul.f32 %v1433_v43, %v2306_v58 }
 0x334   : > { %v872_v22 = vsel %vm2233_vm2, %v868_v14, 0.0  ;;  %v888_v23 = vsub.f32 %v691_v11, %v884_v17  ;;  %v867_v59 = vsub.f32 %v2290_v51, %v862_v16  ;;  %v895_v27 = vmul.f32 %v2361_v38, %v890_v13 }
 0x335   : > { %v913_v26 = vmul.f32 %v872_v22, %v691_v11  ;;  %v883_v50 = vsel %vm2233_vm2, %v878_v19, %v2231_v3  ;;  %v919_v1 = vmul.f32 %v2361_v38, %v915_v8 }
 0x336   : > { %v871_v10 = vsel %vm2233_vm2, %v867_v59, 0.0  ;;  %v887_v58 = vsub.f32 %v690_v18, %v883_v50  ;;  %v892_v51 = vmul.f32 %v888_v23, %v888_v23  ;;  %v898_v3 = vadd.f32 %v895_v27, %v894_v29 }
 0x337   : > { %v912_v28 = vmul.f32 %v871_v10, %v690_v18  ;;  %v917_v32 = vsub.f32 0.0, %v913_v26  ;;  %v922_v33 = vadd.f32 %v919_v1, %v918_v31 }
 0x338   : > { %v891_v30 = vmul.f32 %v887_v58, %v887_v58  ;;  %v897_v34 = vmul.f32 %v2371_v46, %v892_v51 }
 0x339   : > { %v916_v6 = vsub.f32 0.0, %v912_v28  ;;  %v921_v2 = vmul.f32 %v2371_v46, %v917_v32 }
 0x33a   : > { %v896_v4 = vmul.f32 %v2366_v42, %v891_v30 }
 0x33b   : > { %v920_v38 = vmul.f32 %v2366_v42, %v916_v6 }
 0x33c   : > { %v899_v15 = vadd.f32 %v898_v3, %v896_v4 }
 0x33d   : > { %v923_v37 = vadd.f32 %v922_v33, %v920_v38 }
 0x33e   : > { %v900_v36 = vadd.f32 %v899_v15, %v897_v34 }
 0x33f   : > { %v924_v39 = vadd.f32 %v923_v37, %v921_v2 }
 0x340   : > { %974 = vst [vmem:[%s2380_s26] sm:$0xff] %v900_v36 }
 0x341   : > { %978 = vst [vmem:[%s2380_s26 + $0x10] sm:$0xff] %v924_v39 }
 0x342   : > { %1687 = shalt.err (!%p1684_p11)
}
 0x343   : > { %s1688_s20 = scalar_lea.hbm %s2453_s12, 768  ;;  %s1692_s18 = scalar_lea.hbm %s2587_s15, 1536 }
 0x344   : > { %p1689_p13 = scmp.ne.s32.totalorder %s2453_s12, %s1688_s20  ;;  %p1693_p8 = scmp.lt.u32.totalorder %s2453_s12, %s2587_s15 }
 0x345   : > { %p1694_p4 = scmp.lt.u32.totalorder %s1692_s18, %s1688_s20  ;;  %p1696_p1 = scmp.lt.u32.totalorder %s1688_s20, %s2453_s12 }
 0x346   : > { %p1690_p7 = pnand %p1689_p13, %p2588_p5 }
 0x347   : > { %p1695_p10 = por %p1694_p4, %p1693_p8 }
 0x348   : > { %p1691_p9 = pneg %p1690_p7 }
 0x349   : > { %p1697_p12 = por %p1696_p1, %p1695_p10 }
 0x34b   : > { %p1698_p3 = pnand %p1697_p12, %p1691_p9 }
 0x34d   : > { %1701 = shalt.err (!%p1698_p3)
}
 0x34e   : > { %s1791_s17 = smov 128   ;;  %s1792_s24 = smov 8  }
 0x34f   : > { %1315 = dma.vmem_to_hbm [thread:$0]  (%p2588_p5), %s2455_s23, 768, %s2453_s12, %s986_s30, %s1791_s17, %s1791_s17, %s1792_s24  }
 0x350 PF: > { %s2589_s26 = sld [smem:[#allocation29_spill]]  ;;  %s2590_s13 = sld [smem:[#allocation37_spill]] }
 0x351   : > { %s2591_s22 = sld [smem:[#allocation33_spill]] }
 0x356   : > { %s1014_s28 = sand.u32 1, %s2589_s26   ;;  %p2592_p0 = scmp.ne.s32.totalorder %s2590_s13, 0 }
 0x357   : > { %p2593_p6 = scmp.ge.s32.totalorder %s2591_s22, 2  ;;  %s1015_s19 = scalar_lea.sflag [#allocation10], %s1014_s28 }
 0x359   : > { %p1343_p2 = pnand %p2593_p6, %p2592_p0 }
 0x35b   : > { %1747 = dma.done.wait (!%p1343_p2), %s1015_s19, 768  }
 0x35c   : > { %1749 = vsyncadd (!%p1343_p2), %s1015_s19, 4294966528  ;;  %s37_s14 = sadd.s32 1, %s2591_s22   ;;  %s2594_s6 = sld [smem:[#allocation30_spill]] }
 0x35d   : > { %p34_p11 = scmp.ge.s32.totalorder %s37_s14, 4   ;;  %s2595_s11 = sld [smem:[#allocation36_spill]] }
 0x35e   : > { %s2596_s12 = sld [smem:[#allocation32_spill]]  ;;  %s2597_s13 = sld [smem:[#allocation34_spill]] }
 0x35f   : > { %s2598_s30 = smov %s1756_s10  ;;  %36 = sbr.rel (!%p34_p11) target bundleno = 21 (0x15), region = 197 }
 0x362   : > { %s2599_s10 = smov %s2594_s6 }
 0x366   :  { %1020 = vsyncpa [#allocation9], 1 }
 0x367   :  { %1022 = vsyncpa [#allocation9 + $0x1], 1 }
 0x368   :  { %1023 = vsyncpa [#allocation12], 1 }
 0x369   :  { %1025 = vsyncpa [#allocation12 + $0x1], 1 }
 0x36a   :  { %1026 = vsyncpa [#allocation15], 1 }
 0x36b   :  { %1028 = vsyncpa [#allocation15 + $0x1], 1 }
 0x36c   :  { %1029 = vsyncpa [#allocation18], 1 }
 0x36d   :  { %1031 = vsyncpa [#allocation18 + $0x1], 1 }
 0x36e   :  { %1032 = vsyncpa [#allocation21], 1 }
 0x36f   :  { %1034 = vsyncpa [#allocation21 + $0x1], 1 }
 0x370   :  { %1035 = vsyncpa [#allocation10], 1 }
 0x371   :  { %1037 = vsyncpa [#allocation10 + $0x1], 1 }

</bundles_post_ra>
